<compile_context>
chip_gen: v7x
topology: tpu7x:2x2x1
jax: 0.10.0
libtpu: 0.0.40
codegen_flags: <defaults>
</compile_context>

<pallas_src>
import functools
import math

import jax
import jax.numpy as jnp
from jax.experimental import pallas as pl
from jax.experimental.pallas import tpu as pltpu

# ----------------------------- model config ---------------------------------
PATCH = 8
IMG = 16
C_IN = 3
P_TOK = (IMG // PATCH) ** 2            # 4 patch tokens per image
T_TOK = P_TOK + 1                      # 5 real tokens (CLS + patches)
D_PATCH = C_IN * PATCH * PATCH         # 192
D_MODEL = 32
N_HEADS = 2
HEAD_DIM = D_MODEL // N_HEADS
D_MLP = 4 * D_MODEL                    # 128
D_OUT = 64
D_OUT_PAD = 128                        # lane-dense padded output width

N_COND_FRAMES = 2
N_COPIES = 2

MAX_B_BLK = 512                        # images per grid step (few MiB working set)

# packed matrix lane offsets inside w_mats (D_MODEL, 352)
_M1C = 0
_PRC = D_MLP                           # 128
_SCC = _PRC + D_OUT_PAD                # 256
_VC = _SCC + D_MODEL                   # 288
_AOC = _VC + D_MODEL                   # 320
_WMATS_W = _AOC + D_MODEL              # 352

# rows of the packed (N_VEC_ROWS_PAD, 128) small-parameter table
(_LNPRE_G, _LNPRE_B, _LN1_G, _LN1_B, _B_SC, _B_V, _B_AO,
 _LN2_G, _LN2_B, _B_M1, _B_M2, _LNPOST_G, _LNPOST_B,
 _TOKCLS, _VCLS, _BIAS_T0) = range(16)
N_VEC_ROWS = _BIAS_T0 + P_TOK          # 19
N_VEC_ROWS_PAD = 24                    # sublane-tile aligned


# ----------------------------- kernel helpers -------------------------------
def _layer_norm(x, g, b, eps=1e-5):
    m = jnp.mean(x, axis=-1, keepdims=True)
    v = jnp.mean((x - m) ** 2, axis=-1, keepdims=True)
    return (x - m) * jax.lax.rsqrt(v + eps) * g + b


def _gelu(x):
    # TODO(synk): OpenCLIP's ViT MLP uses exact (erf) nn.GELU; tanh approx
    # kept here (matches this synthetic embedder, ~1e-3 deviation).
    c = math.sqrt(2.0 / math.pi)
    return 0.5 * x * (1.0 + jnp.tanh(c * (x + 0.044715 * x * x * x)))


# ----------------------------- pallas kernel --------------------------------
def clip_cls_kernel(x_ref, wpatch_ref, wmats_ref, wm2_ref, vecs_ref, out_ref):
    """One grid step: b_blk images -> (b_blk, 128) projected CLS embeddings.

    x_ref:      (P_TOK, b_blk, D_PATCH) bf16, token-major patch pixels.
    wpatch_ref: (D_PATCH, D_MODEL)      bf16, CLIP-normalize-folded patch embed.
    wmats_ref:  (D_MODEL, 352)          bf16, packed [W_m1|W_proj|W_sc|W_v|W_ao].
    wm2_ref:    (D_MLP, D_MODEL)        bf16.
    vecs_ref:   (N_VEC_ROWS_PAD, 128)   f32, small vectors / biases / constants.
    out_ref:    (b_blk, D_OUT_PAD)      f32.
    """
    b_blk = out_ref.shape[0]
    vp = vecs_ref[...]                                  # (rows, 128) f32

    def vrow(r, w):
        return vp[r:r + 1, :w]                          # (1, w) static slice

    wm = wmats_ref[...]                                 # (32, 352) bf16
    w_m1 = wm[:, _M1C:_M1C + D_MLP]
    w_proj = wm[:, _PRC:_PRC + D_OUT_PAD]
    w_sc = wm[:, _SCC:_SCC + D_MODEL]
    w_v = wm[:, _VC:_VC + D_MODEL]
    w_ao = wm[:, _AOC:_AOC + D_MODEL]
    wpatch = wpatch_ref[...]                            # (192, 32) bf16

    lnpre_g = vrow(_LNPRE_G, D_MODEL); lnpre_b = vrow(_LNPRE_B, D_MODEL)
    ln1_g = vrow(_LN1_G, D_MODEL); ln1_b = vrow(_LN1_B, D_MODEL)
    b_sc = vrow(_B_SC, D_MODEL)
    b_v = vrow(_B_V, D_MODEL)

    # Attention accumulators over the 4 patch keys.  The CLS key contributes
    # exp(s_cls - s_cls) = 1 to the denominator and 1 * v_cls to the numerator
    # (added after the loop).  Scores are replicated 16x per head so the
    # softmax weighting of V stays purely elementwise and lane-aligned.
    den = jnp.zeros((b_blk, D_MODEL), jnp.float32)
    num = jnp.zeros((b_blk, D_MODEL), jnp.float32)

    for t in range(P_TOK):                              # static 4-way unroll
        x_t = x_ref[t]                                  # (b_blk, 192) bf16
        tok_t = jnp.dot(x_t, wpatch, preferred_element_type=jnp.float32)
        tok_t = tok_t + vrow(_BIAS_T0 + t, D_MODEL)     # folded patch bias + pos
        h_t = _layer_norm(tok_t, lnpre_g, lnpre_b)      # ln_pre
        h_t = _layer_norm(h_t, ln1_g, ln1_b)            # ln_1
        h_bf = h_t.astype(jnp.bfloat16)
        # Per-head score (q_cls folded, CLS-score-shifted, replicated x16)
        # and value vector for this patch token.
        s_t = jnp.dot(h_bf, w_sc, preferred_element_type=jnp.float32) + b_sc
        v_t = jnp.dot(h_bf, w_v, preferred_element_type=jnp.float32) + b_v
        e_t = jnp.exp(s_t)
        den = den + e_t
        num = num + e_t * v_t

    den = den + 1.0                                     # CLS key contribution
    num = num + vrow(_VCLS, D_MODEL)                    # CLS value contribution
    o = num * pl.reciprocal(den, approx=True)           # (b_blk, 32) head-concat

    # ---- CLS-row-only epilogue: attn-out proj, residual, MLP, ln_post, proj.
    attn = jnp.dot(o.astype(jnp.bfloat16), w_ao,
                   preferred_element_type=jnp.float32) + vrow(_B_AO, D_MODEL)
    tok_c = vrow(_TOKCLS, D_MODEL) + attn               # residual (CLS stream)

    h2 = _layer_norm(tok_c, vrow(_LN2_G, D_MODEL), vrow(_LN2_B, D_MODEL))
    m = jnp.dot(h2.astype(jnp.bfloat16), w_m1,
                preferred_element_type=jnp.float32) + vrow(_B_M1, D_MLP)
    m = _gelu(m)
    m = jnp.dot(m.astype(jnp.bfloat16), wm2_ref[...],
                preferred_element_type=jnp.float32) + vrow(_B_M2, D_MODEL)
    tok_c = tok_c + m

    cls = _layer_norm(tok_c, vrow(_LNPOST_G, D_MODEL), vrow(_LNPOST_B, D_MODEL))
    out_ref[...] = jnp.dot(cls.astype(jnp.bfloat16), w_proj,
                           preferred_element_type=jnp.float32)


# ----------------------------- wrapper ---------------------------------------
def _round_up(x, m):
    return (x + m - 1) // m * m


def _pack_params(params):
    """Fold all CLS / normalization / query constants; no b_blk dependence."""
    f32 = jnp.float32
    stdinv = params["norm_std_inv"].reshape(-1).astype(f32)
    mean = params["norm_mean"].reshape(-1).astype(f32)
    w_patch = params["w_patch"].astype(f32)

    # CLIP mean/std normalization folded into the patch-embed weights.
    w_patch_n = stdinv[:, None] * w_patch                           # (192, 32)
    b_patch_n = params["b_patch"].reshape(-1) - (mean * stdinv) @ w_patch

    def ln_vec(x, g, b, eps=1e-5):
        m = jnp.mean(x)
        v = jnp.mean((x - m) ** 2)
        return (x - m) * jax.lax.rsqrt(v + eps) * g.reshape(-1) + b.reshape(-1)

    # CLS token path is parameter-only (its "patch" is zero): fold everything.
    cls_raw = (params["cls"] + params["pos"][0:1]).reshape(-1)
    tok_cls = ln_vec(cls_raw, params["lnpre_g"], params["lnpre_b"])
    h_cls = ln_vec(tok_cls, params["ln1_g"], params["ln1_b"])

    w_qkv = params["w_qkv"].astype(f32)
    b_qkv = params["b_qkv"].reshape(-1).astype(f32)
    w_q, w_k, w_v = w_qkv[:, :D_MODEL], w_qkv[:, D_MODEL:2 * D_MODEL], w_qkv[:, 2 * D_MODEL:]
    b_q, b_k, b_v = b_qkv[:D_MODEL], b_qkv[D_MODEL:2 * D_MODEL], b_qkv[2 * D_MODEL:]

    q_cls = h_cls @ w_q + b_q
    k_cls = h_cls @ w_k + b_k
    v_cls = h_cls @ w_v + b_v

    # Score matrix: s_rep = (h @ W_k + b_k) @ M * scale, with M block-diagonal
    # per head carrying q_cls -> per-head score replicated over 16 lanes.
    # Shift by the constant CLS score (exact softmax invariance).
    scale = 1.0 / math.sqrt(HEAD_DIM)
    head_of = jnp.arange(D_MODEL) // HEAD_DIM
    m_q = jnp.where(head_of[:, None] == head_of[None, :], q_cls[:, None], 0.0)
    w_sc = scale * (w_k @ m_q)                                      # (32, 32)
    s_cls = scale * (k_cls @ m_q)                                   # (32,) replicated
    b_sc = scale * (b_k @ m_q) - s_cls

    # Per-patch-slot additive bias (folded patch bias + positional embedding).
    bias_slots = b_patch_n[None, :] + params["pos"][1:1 + P_TOK]    # (4, 32)

    # Packed big-matrix operand.
    w_proj_pad = jnp.zeros((D_MODEL, D_OUT_PAD), f32).at[:, :D_OUT].set(
        params["w_proj"])
    w_mats = jnp.concatenate(
        [params["w_m1"], w_proj_pad, w_sc, w_v, params["w_ao"]],
        axis=1).astype(jnp.bfloat16)                                # (32, 352)

    def pad_row(v):
        v = jnp.asarray(v, f32).reshape(-1)
        return jnp.zeros((128,), f32).at[:v.shape[0]].set(v)

    rows = [
        pad_row(params["lnpre_g"]), pad_row(params["lnpre_b"]),
        pad_row(params["ln1_g"]), pad_row(params["ln1_b"]),
        pad_row(b_sc), pad_row(b_v), pad_row(params["b_ao"]),
        pad_row(params["ln2_g"]), pad_row(params["ln2_b"]),
        pad_row(params["b_m1"]), pad_row(params["b_m2"]),
        pad_row(params["lnpost_g"]), pad_row(params["lnpost_b"]),
        pad_row(tok_cls), pad_row(v_cls),
    ] + [pad_row(bias_slots[t]) for t in range(P_TOK)]
    vecs = jnp.zeros((N_VEC_ROWS_PAD, 128), f32).at[:len(rows)].set(
        jnp.stack(rows, axis=0))

    return (w_patch_n.astype(jnp.bfloat16), w_mats,
            params["w_m2"].astype(jnp.bfloat16), vecs)


def open_clip_image_embed(vid_nchw, params):
    """Synthetic open_clip image embedder: (N, C, H, W) -> (N, D_OUT)."""
    n, c, h, w = vid_nchw.shape
    p = PATCH
    assert (c, h, w) == (C_IN, IMG, IMG)

    # Images per grid step: single step for small batches (v5e/v6e); for large
    # n multiple steps appear naturally (>=2 feeds both v7x TensorCores).
    b_blk = min(MAX_B_BLK, _round_up(max(n, 1), 8))
    n_pad = _round_up(n, b_blk)

    # Unfold into patches with PyTorch Conv2d (C, ph, pw) flatten order, then
    # go token-major so the kernel's per-image token reduction is a plain
    # 4-slab accumulation.  Only real patch rows are DMA'd (no zero slots).
    x = vid_nchw.reshape(n, c, h // p, p, w // p, p)
    x = x.transpose(0, 2, 4, 1, 3, 5)
    patches = x.reshape(n, P_TOK, D_PATCH)
    patches_tm = patches.transpose(1, 0, 2).astype(jnp.bfloat16)    # (4, n, 192)
    if n == n_pad:
        x_tm = patches_tm
    else:
        x_tm = jnp.zeros((P_TOK, n_pad, D_PATCH), jnp.bfloat16)
        x_tm = x_tm.at[:, :n, :].set(patches_tm)

    w_patch_bf, w_mats, w_m2_bf, vecs = _pack_params(params)

    out = pl.pallas_call(
        clip_cls_kernel,
        out_shape=jax.ShapeDtypeStruct((n_pad, D_OUT_PAD), jnp.float32),
        grid_spec=pltpu.PrefetchScalarGridSpec(
            num_scalar_prefetch=0,
            grid=(n_pad // b_blk,),
            in_specs=[
                pl.BlockSpec((P_TOK, b_blk, D_PATCH), lambda i: (0, i, 0)),
                pl.BlockSpec((D_PATCH, D_MODEL), lambda i: (0, 0)),
                pl.BlockSpec((D_MODEL, _WMATS_W), lambda i: (0, 0)),
                pl.BlockSpec((D_MLP, D_MODEL), lambda i: (0, 0)),
                pl.BlockSpec((N_VEC_ROWS_PAD, 128), lambda i: (0, 0)),
            ],
            out_specs=pl.BlockSpec((b_blk, D_OUT_PAD), lambda i: (i, 0)),
        ),
        compiler_params=pltpu.CompilerParams(
            dimension_semantics=("parallel",),
            vmem_limit_bytes=32 * 1024 * 1024),
    )(x_tm, w_patch_bf, w_mats, w_m2_bf, vecs)

    return out[:n, :D_OUT]


def frozen_openclip_image_prediction_embedder(vid, params,
                                              n_cond_frames=N_COND_FRAMES,
                                              n_copies=N_COPIES):
    emb = open_clip_image_embed(vid, params)          # ((b t), d)
    bt, d = emb.shape
    b = bt // n_cond_frames
    emb = emb.reshape(b, n_cond_frames, d)            # '(b t) d -> b t d'
    emb = jnp.repeat(emb, n_copies, axis=0)           # 'b t d -> (b s) t d'
    return emb


# ----------------------------- parameter init --------------------------------
def init_params(key):
    ks = jax.random.split(key, 12)
    s = 0.02
    clip_mean = jnp.asarray([0.48145466, 0.4578275, 0.40821073], jnp.float32)
    clip_std = jnp.asarray([0.26862954, 0.26130258, 0.27577711], jnp.float32)
    norm_mean = jnp.repeat(clip_mean, PATCH * PATCH).reshape(1, D_PATCH)
    norm_std_inv = (1.0 / jnp.repeat(clip_std, PATCH * PATCH)).reshape(1, D_PATCH)
    return {
        "norm_mean": norm_mean,
        "norm_std_inv": norm_std_inv,
        "w_patch": s * jax.random.normal(ks[0], (D_PATCH, D_MODEL), jnp.float32),
        "b_patch": jnp.zeros((1, D_MODEL), jnp.float32),
        "cls": s * jax.random.normal(ks[1], (1, D_MODEL), jnp.float32),
        "pos": s * jax.random.normal(ks[2], (T_TOK, D_MODEL), jnp.float32),
        "lnpre_g": jnp.ones((1, D_MODEL), jnp.float32),
        "lnpre_b": jnp.zeros((1, D_MODEL), jnp.float32),
        "ln1_g": jnp.ones((1, D_MODEL), jnp.float32),
        "ln1_b": jnp.zeros((1, D_MODEL), jnp.float32),
        "w_qkv": s * jax.random.normal(ks[3], (D_MODEL, 3 * D_MODEL), jnp.float32),
        "b_qkv": jnp.zeros((1, 3 * D_MODEL), jnp.float32),
        "w_ao": s * jax.random.normal(ks[4], (D_MODEL, D_MODEL), jnp.float32),
        "b_ao": jnp.zeros((1, D_MODEL), jnp.float32),
        "ln2_g": jnp.ones((1, D_MODEL), jnp.float32),
        "ln2_b": jnp.zeros((1, D_MODEL), jnp.float32),
        "w_m1": s * jax.random.normal(ks[5], (D_MODEL, D_MLP), jnp.float32),
        "b_m1": jnp.zeros((1, D_MLP), jnp.float32),
        "w_m2": s * jax.random.normal(ks[6], (D_MLP, D_MODEL), jnp.float32),
        "b_m2": jnp.zeros((1, D_MODEL), jnp.float32),
        "lnpost_g": jnp.ones((1, D_MODEL), jnp.float32),
        "lnpost_b": jnp.zeros((1, D_MODEL), jnp.float32),
        "w_proj": s * jax.random.normal(ks[7], (D_MODEL, D_OUT), jnp.float32),
    }


# ----------------------------- main -------------------------------------------
if __name__ == "__main__":
    key = jax.random.PRNGKey(0)
    k_vid, k_par = jax.random.split(key)

    b = 2
    # vid packs (b * n_cond_frames) frames, NCHW like the PyTorch module input.
    vid = jax.random.uniform(
        k_vid, (b * N_COND_FRAMES, C_IN, IMG, IMG), jnp.float32)
    params = init_params(k_par)

    fwd = jax.jit(functools.partial(
        frozen_openclip_image_prediction_embedder,
        n_cond_frames=N_COND_FRAMES, n_copies=N_COPIES))
    out = fwd(vid, params)
    out = jax.block_until_ready(out)

    expected_shape = (b * N_COPIES, N_COND_FRAMES, D_OUT)
    assert out.shape == expected_shape, (out.shape, expected_shape)
    assert out.dtype == jnp.float32
    assert bool(jnp.all(jnp.isfinite(out)))
    # repeat check: copies of each batch element are identical.
    assert bool(jnp.allclose(out[0], out[1])) and bool(jnp.allclose(out[2], out[3]))

    print("KERNEL_OK")
</pallas_src>

<mosaic_0001>
module attributes {stable_mosaic.version = 11 : i64} {
  func.func @clip_cls_kernel(%arg0: i32, %arg1: memref<4x8x192xbf16, #tpu.memory_space<vmem>>, %arg2: memref<192x32xbf16, #tpu.memory_space<vmem>>, %arg3: memref<32x352xbf16, #tpu.memory_space<vmem>>, %arg4: memref<128x32xbf16, #tpu.memory_space<vmem>>, %arg5: memref<24x128xf32, #tpu.memory_space<vmem>>, %arg6: memref<8x128xf32, #tpu.memory_space<vmem>>) attributes {dimension_semantics = [#tpu.dimension_semantics<parallel>], iteration_bounds = array<i64: 1>, scalar_prefetch = 0 : i64, scratch_operands = 0 : i64, tpu.core_type = #tpu.core_type<tc>, window_params = [{transform_indices = @transform_0, window_bounds = array<i64: 4, 8, 192>}, {pipeline_mode = #tpu.pipeline_mode<synchronous>, transform_indices = @transform_1, window_bounds = array<i64: 192, 32>}, {pipeline_mode = #tpu.pipeline_mode<synchronous>, transform_indices = @transform_2, window_bounds = array<i64: 32, 352>}, {pipeline_mode = #tpu.pipeline_mode<synchronous>, transform_indices = @transform_3, window_bounds = array<i64: 128, 32>}, {pipeline_mode = #tpu.pipeline_mode<synchronous>, transform_indices = @transform_4, window_bounds = array<i64: 24, 128>}, {transform_indices = @transform_5, window_bounds = array<i64: 8, 128>}]} {
    %c0 = arith.constant 0 : index
    %c0_0 = arith.constant 0 : index
    %0 = vector.load %arg5[%c0, %c0_0] : memref<24x128xf32, #tpu.memory_space<vmem>>, vector<24x128xf32>
    %c0_1 = arith.constant 0 : index
    %c0_2 = arith.constant 0 : index
    %1 = vector.load %arg3[%c0_1, %c0_2] : memref<32x352xbf16, #tpu.memory_space<vmem>>, vector<32x352xbf16>
    %2 = vector.extract_strided_slice %1 {offsets = [0, 0], sizes = [32, 128], strides = [1, 1]} : vector<32x352xbf16> to vector<32x128xbf16>
    %3 = vector.extract_strided_slice %1 {offsets = [0, 128], sizes = [32, 128], strides = [1, 1]} : vector<32x352xbf16> to vector<32x128xbf16>
    %4 = vector.extract_strided_slice %1 {offsets = [0, 256], sizes = [32, 32], strides = [1, 1]} : vector<32x352xbf16> to vector<32x32xbf16>
    %5 = vector.extract_strided_slice %1 {offsets = [0, 288], sizes = [32, 32], strides = [1, 1]} : vector<32x352xbf16> to vector<32x32xbf16>
    %6 = vector.extract_strided_slice %1 {offsets = [0, 320], sizes = [32, 32], strides = [1, 1]} : vector<32x352xbf16> to vector<32x32xbf16>
    %c0_3 = arith.constant 0 : index
    %c0_4 = arith.constant 0 : index
    %7 = vector.load %arg2[%c0_3, %c0_4] : memref<192x32xbf16, #tpu.memory_space<vmem>>, vector<192x32xbf16>
    %8 = vector.extract_strided_slice %0 {offsets = [0, 0], sizes = [1, 32], strides = [1, 1]} : vector<24x128xf32> to vector<1x32xf32>
    %9 = vector.extract_strided_slice %0 {offsets = [1, 0], sizes = [1, 32], strides = [1, 1]} : vector<24x128xf32> to vector<1x32xf32>
    %10 = vector.extract_strided_slice %0 {offsets = [2, 0], sizes = [1, 32], strides = [1, 1]} : vector<24x128xf32> to vector<1x32xf32>
    %11 = vector.extract_strided_slice %0 {offsets = [3, 0], sizes = [1, 32], strides = [1, 1]} : vector<24x128xf32> to vector<1x32xf32>
    %12 = vector.extract_strided_slice %0 {offsets = [4, 0], sizes = [1, 32], strides = [1, 1]} : vector<24x128xf32> to vector<1x32xf32>
    %13 = vector.extract_strided_slice %0 {offsets = [5, 0], sizes = [1, 32], strides = [1, 1]} : vector<24x128xf32> to vector<1x32xf32>
    %cst = arith.constant 0.000000e+00 : f32
    %14 = vector.broadcast %cst : f32 to vector<8x32xf32>
    %cst_5 = arith.constant 0.000000e+00 : f32
    %15 = vector.broadcast %cst_5 : f32 to vector<8x32xf32>
    %c0_6 = arith.constant 0 : index
    %c0_7 = arith.constant 0 : index
    %c0_8 = arith.constant 0 : index
    %16 = vector.load %arg1[%c0_6, %c0_7, %c0_8] : memref<4x8x192xbf16, #tpu.memory_space<vmem>>, vector<1x8x192xbf16>
    %17 = vector.shape_cast %16 : vector<1x8x192xbf16> to vector<8x192xbf16>
    %cst_9 = arith.constant dense<0.000000e+00> : vector<8x32xf32>
    %18 = tpu.matmul %17, %7, %cst_9 {dimension_numbers = #tpu.dot_dimension_numbers<[1], [0], [0], [1], [0, 0, 1, 1], [], []>} : vector<8x192xbf16>, vector<192x32xbf16>, vector<8x32xf32> -> vector<8x32xf32>
    %19 = vector.extract_strided_slice %0 {offsets = [15, 0], sizes = [1, 32], strides = [1, 1]} : vector<24x128xf32> to vector<1x32xf32>
    %20 = vector.broadcast %19 : vector<1x32xf32> to vector<8x32xf32>
    %21 = arith.addf %18, %20 : vector<8x32xf32>
    %cst_10 = arith.constant dense<0.000000e+00> : vector<8xf32>
    %22 = vector.multi_reduction <add>, %21, %cst_10 [1] : vector<8x32xf32> to vector<8xf32>
    %23 = vector.shape_cast %22 : vector<8xf32> to vector<8x1xf32>
    %cst_11 = arith.constant 3.200000e+01 : f32
    %24 = vector.broadcast %cst_11 : f32 to vector<8x1xf32>
    %25 = arith.divf %23, %24 : vector<8x1xf32>
    %26 = vector.broadcast %25 : vector<8x1xf32> to vector<8x32xf32>
    %27 = arith.subf %21, %26 : vector<8x32xf32>
    %28 = arith.mulf %27, %27 : vector<8x32xf32>
    %cst_12 = arith.constant dense<0.000000e+00> : vector<8xf32>
    %29 = vector.multi_reduction <add>, %28, %cst_12 [1] : vector<8x32xf32> to vector<8xf32>
    %30 = vector.shape_cast %29 : vector<8xf32> to vector<8x1xf32>
    %cst_13 = arith.constant 3.200000e+01 : f32
    %31 = vector.broadcast %cst_13 : f32 to vector<8x1xf32>
    %32 = arith.divf %30, %31 : vector<8x1xf32>
    %33 = vector.broadcast %25 : vector<8x1xf32> to vector<8x32xf32>
    %34 = arith.subf %21, %33 : vector<8x32xf32>
    %cst_14 = arith.constant 9.99999974E-6 : f32
    %35 = vector.broadcast %cst_14 : f32 to vector<8x1xf32>
    %36 = arith.addf %32, %35 : vector<8x1xf32>
    %37 = math.rsqrt %36 : vector<8x1xf32>
    %38 = vector.broadcast %37 : vector<8x1xf32> to vector<8x32xf32>
    %39 = arith.mulf %34, %38 : vector<8x32xf32>
    %40 = vector.broadcast %8 : vector<1x32xf32> to vector<8x32xf32>
    %41 = arith.mulf %39, %40 : vector<8x32xf32>
    %42 = vector.broadcast %9 : vector<1x32xf32> to vector<8x32xf32>
    %43 = arith.addf %41, %42 : vector<8x32xf32>
    %cst_15 = arith.constant dense<0.000000e+00> : vector<8xf32>
    %44 = vector.multi_reduction <add>, %43, %cst_15 [1] : vector<8x32xf32> to vector<8xf32>
    %45 = vector.shape_cast %44 : vector<8xf32> to vector<8x1xf32>
    %cst_16 = arith.constant 3.200000e+01 : f32
    %46 = vector.broadcast %cst_16 : f32 to vector<8x1xf32>
    %47 = arith.divf %45, %46 : vector<8x1xf32>
    %48 = vector.broadcast %47 : vector<8x1xf32> to vector<8x32xf32>
    %49 = arith.subf %43, %48 : vector<8x32xf32>
    %50 = arith.mulf %49, %49 : vector<8x32xf32>
    %cst_17 = arith.constant dense<0.000000e+00> : vector<8xf32>
    %51 = vector.multi_reduction <add>, %50, %cst_17 [1] : vector<8x32xf32> to vector<8xf32>
    %52 = vector.shape_cast %51 : vector<8xf32> to vector<8x1xf32>
    %cst_18 = arith.constant 3.200000e+01 : f32
    %53 = vector.broadcast %cst_18 : f32 to vector<8x1xf32>
    %54 = arith.divf %52, %53 : vector<8x1xf32>
    %55 = vector.broadcast %47 : vector<8x1xf32> to vector<8x32xf32>
    %56 = arith.subf %43, %55 : vector<8x32xf32>
    %cst_19 = arith.constant 9.99999974E-6 : f32
    %57 = vector.broadcast %cst_19 : f32 to vector<8x1xf32>
    %58 = arith.addf %54, %57 : vector<8x1xf32>
    %59 = math.rsqrt %58 : vector<8x1xf32>
    %60 = vector.broadcast %59 : vector<8x1xf32> to vector<8x32xf32>
    %61 = arith.mulf %56, %60 : vector<8x32xf32>
    %62 = vector.broadcast %10 : vector<1x32xf32> to vector<8x32xf32>
    %63 = arith.mulf %61, %62 : vector<8x32xf32>
    %64 = vector.broadcast %11 : vector<1x32xf32> to vector<8x32xf32>
    %65 = arith.addf %63, %64 : vector<8x32xf32>
    %66 = arith.truncf %65 : vector<8x32xf32> to vector<8x32xbf16>
    %cst_20 = arith.constant dense<0.000000e+00> : vector<8x32xf32>
    %67 = tpu.matmul %66, %4, %cst_20 {dimension_numbers = #tpu.dot_dimension_numbers<[1], [0], [0], [1], [0, 0, 1, 1], [], []>} : vector<8x32xbf16>, vector<32x32xbf16>, vector<8x32xf32> -> vector<8x32xf32>
    %68 = vector.broadcast %12 : vector<1x32xf32> to vector<8x32xf32>
    %69 = arith.addf %67, %68 : vector<8x32xf32>
    %cst_21 = arith.constant dense<0.000000e+00> : vector<8x32xf32>
    %70 = tpu.matmul %66, %5, %cst_21 {dimension_numbers = #tpu.dot_dimension_numbers<[1], [0], [0], [1], [0, 0, 1, 1], [], []>} : vector<8x32xbf16>, vector<32x32xbf16>, vector<8x32xf32> -> vector<8x32xf32>
    %71 = vector.broadcast %13 : vector<1x32xf32> to vector<8x32xf32>
    %72 = arith.addf %70, %71 : vector<8x32xf32>
    %73 = math.exp %69 : vector<8x32xf32>
    %74 = arith.addf %14, %73 : vector<8x32xf32>
    %75 = arith.mulf %73, %72 : vector<8x32xf32>
    %76 = arith.addf %15, %75 : vector<8x32xf32>
    %c1 = arith.constant 1 : index
    %c0_22 = arith.constant 0 : index
    %c0_23 = arith.constant 0 : index
    %77 = vector.load %arg1[%c1, %c0_22, %c0_23] : memref<4x8x192xbf16, #tpu.memory_space<vmem>>, vector<1x8x192xbf16>
    %78 = vector.shape_cast %77 : vector<1x8x192xbf16> to vector<8x192xbf16>
    %cst_24 = arith.constant dense<0.000000e+00> : vector<8x32xf32>
    %79 = tpu.matmul %78, %7, %cst_24 {dimension_numbers = #tpu.dot_dimension_numbers<[1], [0], [0], [1], [0, 0, 1, 1], [], []>} : vector<8x192xbf16>, vector<192x32xbf16>, vector<8x32xf32> -> vector<8x32xf32>
    %80 = vector.extract_strided_slice %0 {offsets = [16, 0], sizes = [1, 32], strides = [1, 1]} : vector<24x128xf32> to vector<1x32xf32>
    %81 = vector.broadcast %80 : vector<1x32xf32> to vector<8x32xf32>
    %82 = arith.addf %79, %81 : vector<8x32xf32>
    %cst_25 = arith.constant dense<0.000000e+00> : vector<8xf32>
    %83 = vector.multi_reduction <add>, %82, %cst_25 [1] : vector<8x32xf32> to vector<8xf32>
    %84 = vector.shape_cast %83 : vector<8xf32> to vector<8x1xf32>
    %cst_26 = arith.constant 3.200000e+01 : f32
    %85 = vector.broadcast %cst_26 : f32 to vector<8x1xf32>
    %86 = arith.divf %84, %85 : vector<8x1xf32>
    %87 = vector.broadcast %86 : vector<8x1xf32> to vector<8x32xf32>
    %88 = arith.subf %82, %87 : vector<8x32xf32>
    %89 = arith.mulf %88, %88 : vector<8x32xf32>
    %cst_27 = arith.constant dense<0.000000e+00> : vector<8xf32>
    %90 = vector.multi_reduction <add>, %89, %cst_27 [1] : vector<8x32xf32> to vector<8xf32>
    %91 = vector.shape_cast %90 : vector<8xf32> to vector<8x1xf32>
    %cst_28 = arith.constant 3.200000e+01 : f32
    %92 = vector.broadcast %cst_28 : f32 to vector<8x1xf32>
    %93 = arith.divf %91, %92 : vector<8x1xf32>
    %94 = vector.broadcast %86 : vector<8x1xf32> to vector<8x32xf32>
    %95 = arith.subf %82, %94 : vector<8x32xf32>
    %cst_29 = arith.constant 9.99999974E-6 : f32
    %96 = vector.broadcast %cst_29 : f32 to vector<8x1xf32>
    %97 = arith.addf %93, %96 : vector<8x1xf32>
    %98 = math.rsqrt %97 : vector<8x1xf32>
    %99 = vector.broadcast %98 : vector<8x1xf32> to vector<8x32xf32>
    %100 = arith.mulf %95, %99 : vector<8x32xf32>
    %101 = vector.broadcast %8 : vector<1x32xf32> to vector<8x32xf32>
    %102 = arith.mulf %100, %101 : vector<8x32xf32>
    %103 = vector.broadcast %9 : vector<1x32xf32> to vector<8x32xf32>
    %104 = arith.addf %102, %103 : vector<8x32xf32>
    %cst_30 = arith.constant dense<0.000000e+00> : vector<8xf32>
    %105 = vector.multi_reduction <add>, %104, %cst_30 [1] : vector<8x32xf32> to vector<8xf32>
    %106 = vector.shape_cast %105 : vector<8xf32> to vector<8x1xf32>
    %cst_31 = arith.constant 3.200000e+01 : f32
    %107 = vector.broadcast %cst_31 : f32 to vector<8x1xf32>
    %108 = arith.divf %106, %107 : vector<8x1xf32>
    %109 = vector.broadcast %108 : vector<8x1xf32> to vector<8x32xf32>
    %110 = arith.subf %104, %109 : vector<8x32xf32>
    %111 = arith.mulf %110, %110 : vector<8x32xf32>
    %cst_32 = arith.constant dense<0.000000e+00> : vector<8xf32>
    %112 = vector.multi_reduction <add>, %111, %cst_32 [1] : vector<8x32xf32> to vector<8xf32>
    %113 = vector.shape_cast %112 : vector<8xf32> to vector<8x1xf32>
    %cst_33 = arith.constant 3.200000e+01 : f32
    %114 = vector.broadcast %cst_33 : f32 to vector<8x1xf32>
    %115 = arith.divf %113, %114 : vector<8x1xf32>
    %116 = vector.broadcast %108 : vector<8x1xf32> to vector<8x32xf32>
    %117 = arith.subf %104, %116 : vector<8x32xf32>
    %cst_34 = arith.constant 9.99999974E-6 : f32
    %118 = vector.broadcast %cst_34 : f32 to vector<8x1xf32>
    %119 = arith.addf %115, %118 : vector<8x1xf32>
    %120 = math.rsqrt %119 : vector<8x1xf32>
    %121 = vector.broadcast %120 : vector<8x1xf32> to vector<8x32xf32>
    %122 = arith.mulf %117, %121 : vector<8x32xf32>
    %123 = vector.broadcast %10 : vector<1x32xf32> to vector<8x32xf32>
    %124 = arith.mulf %122, %123 : vector<8x32xf32>
    %125 = vector.broadcast %11 : vector<1x32xf32> to vector<8x32xf32>
    %126 = arith.addf %124, %125 : vector<8x32xf32>
    %127 = arith.truncf %126 : vector<8x32xf32> to vector<8x32xbf16>
    %cst_35 = arith.constant dense<0.000000e+00> : vector<8x32xf32>
    %128 = tpu.matmul %127, %4, %cst_35 {dimension_numbers = #tpu.dot_dimension_numbers<[1], [0], [0], [1], [0, 0, 1, 1], [], []>} : vector<8x32xbf16>, vector<32x32xbf16>, vector<8x32xf32> -> vector<8x32xf32>
    %129 = vector.broadcast %12 : vector<1x32xf32> to vector<8x32xf32>
    %130 = arith.addf %128, %129 : vector<8x32xf32>
    %cst_36 = arith.constant dense<0.000000e+00> : vector<8x32xf32>
    %131 = tpu.matmul %127, %5, %cst_36 {dimension_numbers = #tpu.dot_dimension_numbers<[1], [0], [0], [1], [0, 0, 1, 1], [], []>} : vector<8x32xbf16>, vector<32x32xbf16>, vector<8x32xf32> -> vector<8x32xf32>
    %132 = vector.broadcast %13 : vector<1x32xf32> to vector<8x32xf32>
    %133 = arith.addf %131, %132 : vector<8x32xf32>
    %134 = math.exp %130 : vector<8x32xf32>
    %135 = arith.addf %74, %134 : vector<8x32xf32>
    %136 = arith.mulf %134, %133 : vector<8x32xf32>
    %137 = arith.addf %76, %136 : vector<8x32xf32>
    %c2 = arith.constant 2 : index
    %c0_37 = arith.constant 0 : index
    %c0_38 = arith.constant 0 : index
    %138 = vector.load %arg1[%c2, %c0_37, %c0_38] : memref<4x8x192xbf16, #tpu.memory_space<vmem>>, vector<1x8x192xbf16>
    %139 = vector.shape_cast %138 : vector<1x8x192xbf16> to vector<8x192xbf16>
    %cst_39 = arith.constant dense<0.000000e+00> : vector<8x32xf32>
    %140 = tpu.matmul %139, %7, %cst_39 {dimension_numbers = #tpu.dot_dimension_numbers<[1], [0], [0], [1], [0, 0, 1, 1], [], []>} : vector<8x192xbf16>, vector<192x32xbf16>, vector<8x32xf32> -> vector<8x32xf32>
    %141 = vector.extract_strided_slice %0 {offsets = [17, 0], sizes = [1, 32], strides = [1, 1]} : vector<24x128xf32> to vector<1x32xf32>
    %142 = vector.broadcast %141 : vector<1x32xf32> to vector<8x32xf32>
    %143 = arith.addf %140, %142 : vector<8x32xf32>
    %cst_40 = arith.constant dense<0.000000e+00> : vector<8xf32>
    %144 = vector.multi_reduction <add>, %143, %cst_40 [1] : vector<8x32xf32> to vector<8xf32>
    %145 = vector.shape_cast %144 : vector<8xf32> to vector<8x1xf32>
    %cst_41 = arith.constant 3.200000e+01 : f32
    %146 = vector.broadcast %cst_41 : f32 to vector<8x1xf32>
    %147 = arith.divf %145, %146 : vector<8x1xf32>
    %148 = vector.broadcast %147 : vector<8x1xf32> to vector<8x32xf32>
    %149 = arith.subf %143, %148 : vector<8x32xf32>
    %150 = arith.mulf %149, %149 : vector<8x32xf32>
    %cst_42 = arith.constant dense<0.000000e+00> : vector<8xf32>
    %151 = vector.multi_reduction <add>, %150, %cst_42 [1] : vector<8x32xf32> to vector<8xf32>
    %152 = vector.shape_cast %151 : vector<8xf32> to vector<8x1xf32>
    %cst_43 = arith.constant 3.200000e+01 : f32
    %153 = vector.broadcast %cst_43 : f32 to vector<8x1xf32>
    %154 = arith.divf %152, %153 : vector<8x1xf32>
    %155 = vector.broadcast %147 : vector<8x1xf32> to vector<8x32xf32>
    %156 = arith.subf %143, %155 : vector<8x32xf32>
    %cst_44 = arith.constant 9.99999974E-6 : f32
    %157 = vector.broadcast %cst_44 : f32 to vector<8x1xf32>
    %158 = arith.addf %154, %157 : vector<8x1xf32>
    %159 = math.rsqrt %158 : vector<8x1xf32>
    %160 = vector.broadcast %159 : vector<8x1xf32> to vector<8x32xf32>
    %161 = arith.mulf %156, %160 : vector<8x32xf32>
    %162 = vector.broadcast %8 : vector<1x32xf32> to vector<8x32xf32>
    %163 = arith.mulf %161, %162 : vector<8x32xf32>
    %164 = vector.broadcast %9 : vector<1x32xf32> to vector<8x32xf32>
    %165 = arith.addf %163, %164 : vector<8x32xf32>
    %cst_45 = arith.constant dense<0.000000e+00> : vector<8xf32>
    %166 = vector.multi_reduction <add>, %165, %cst_45 [1] : vector<8x32xf32> to vector<8xf32>
    %167 = vector.shape_cast %166 : vector<8xf32> to vector<8x1xf32>
    %cst_46 = arith.constant 3.200000e+01 : f32
    %168 = vector.broadcast %cst_46 : f32 to vector<8x1xf32>
    %169 = arith.divf %167, %168 : vector<8x1xf32>
    %170 = vector.broadcast %169 : vector<8x1xf32> to vector<8x32xf32>
    %171 = arith.subf %165, %170 : vector<8x32xf32>
    %172 = arith.mulf %171, %171 : vector<8x32xf32>
    %cst_47 = arith.constant dense<0.000000e+00> : vector<8xf32>
    %173 = vector.multi_reduction <add>, %172, %cst_47 [1] : vector<8x32xf32> to vector<8xf32>
    %174 = vector.shape_cast %173 : vector<8xf32> to vector<8x1xf32>
    %cst_48 = arith.constant 3.200000e+01 : f32
    %175 = vector.broadcast %cst_48 : f32 to vector<8x1xf32>
    %176 = arith.divf %174, %175 : vector<8x1xf32>
    %177 = vector.broadcast %169 : vector<8x1xf32> to vector<8x32xf32>
    %178 = arith.subf %165, %177 : vector<8x32xf32>
    %cst_49 = arith.constant 9.99999974E-6 : f32
    %179 = vector.broadcast %cst_49 : f32 to vector<8x1xf32>
    %180 = arith.addf %176, %179 : vector<8x1xf32>
    %181 = math.rsqrt %180 : vector<8x1xf32>
    %182 = vector.broadcast %181 : vector<8x1xf32> to vector<8x32xf32>
    %183 = arith.mulf %178, %182 : vector<8x32xf32>
    %184 = vector.broadcast %10 : vector<1x32xf32> to vector<8x32xf32>
    %185 = arith.mulf %183, %184 : vector<8x32xf32>
    %186 = vector.broadcast %11 : vector<1x32xf32> to vector<8x32xf32>
    %187 = arith.addf %185, %186 : vector<8x32xf32>
    %188 = arith.truncf %187 : vector<8x32xf32> to vector<8x32xbf16>
    %cst_50 = arith.constant dense<0.000000e+00> : vector<8x32xf32>
    %189 = tpu.matmul %188, %4, %cst_50 {dimension_numbers = #tpu.dot_dimension_numbers<[1], [0], [0], [1], [0, 0, 1, 1], [], []>} : vector<8x32xbf16>, vector<32x32xbf16>, vector<8x32xf32> -> vector<8x32xf32>
    %190 = vector.broadcast %12 : vector<1x32xf32> to vector<8x32xf32>
    %191 = arith.addf %189, %190 : vector<8x32xf32>
    %cst_51 = arith.constant dense<0.000000e+00> : vector<8x32xf32>
    %192 = tpu.matmul %188, %5, %cst_51 {dimension_numbers = #tpu.dot_dimension_numbers<[1], [0], [0], [1], [0, 0, 1, 1], [], []>} : vector<8x32xbf16>, vector<32x32xbf16>, vector<8x32xf32> -> vector<8x32xf32>
    %193 = vector.broadcast %13 : vector<1x32xf32> to vector<8x32xf32>
    %194 = arith.addf %192, %193 : vector<8x32xf32>
    %195 = math.exp %191 : vector<8x32xf32>
    %196 = arith.addf %135, %195 : vector<8x32xf32>
    %197 = arith.mulf %195, %194 : vector<8x32xf32>
    %198 = arith.addf %137, %197 : vector<8x32xf32>
    %c3 = arith.constant 3 : index
    %c0_52 = arith.constant 0 : index
    %c0_53 = arith.constant 0 : index
    %199 = vector.load %arg1[%c3, %c0_52, %c0_53] : memref<4x8x192xbf16, #tpu.memory_space<vmem>>, vector<1x8x192xbf16>
    %200 = vector.shape_cast %199 : vector<1x8x192xbf16> to vector<8x192xbf16>
    %cst_54 = arith.constant dense<0.000000e+00> : vector<8x32xf32>
    %201 = tpu.matmul %200, %7, %cst_54 {dimension_numbers = #tpu.dot_dimension_numbers<[1], [0], [0], [1], [0, 0, 1, 1], [], []>} : vector<8x192xbf16>, vector<192x32xbf16>, vector<8x32xf32> -> vector<8x32xf32>
    %202 = vector.extract_strided_slice %0 {offsets = [18, 0], sizes = [1, 32], strides = [1, 1]} : vector<24x128xf32> to vector<1x32xf32>
    %203 = vector.broadcast %202 : vector<1x32xf32> to vector<8x32xf32>
    %204 = arith.addf %201, %203 : vector<8x32xf32>
    %cst_55 = arith.constant dense<0.000000e+00> : vector<8xf32>
    %205 = vector.multi_reduction <add>, %204, %cst_55 [1] : vector<8x32xf32> to vector<8xf32>
    %206 = vector.shape_cast %205 : vector<8xf32> to vector<8x1xf32>
    %cst_56 = arith.constant 3.200000e+01 : f32
    %207 = vector.broadcast %cst_56 : f32 to vector<8x1xf32>
    %208 = arith.divf %206, %207 : vector<8x1xf32>
    %209 = vector.broadcast %208 : vector<8x1xf32> to vector<8x32xf32>
    %210 = arith.subf %204, %209 : vector<8x32xf32>
    %211 = arith.mulf %210, %210 : vector<8x32xf32>
    %cst_57 = arith.constant dense<0.000000e+00> : vector<8xf32>
    %212 = vector.multi_reduction <add>, %211, %cst_57 [1] : vector<8x32xf32> to vector<8xf32>
    %213 = vector.shape_cast %212 : vector<8xf32> to vector<8x1xf32>
    %cst_58 = arith.constant 3.200000e+01 : f32
    %214 = vector.broadcast %cst_58 : f32 to vector<8x1xf32>
    %215 = arith.divf %213, %214 : vector<8x1xf32>
    %216 = vector.broadcast %208 : vector<8x1xf32> to vector<8x32xf32>
    %217 = arith.subf %204, %216 : vector<8x32xf32>
    %cst_59 = arith.constant 9.99999974E-6 : f32
    %218 = vector.broadcast %cst_59 : f32 to vector<8x1xf32>
    %219 = arith.addf %215, %218 : vector<8x1xf32>
    %220 = math.rsqrt %219 : vector<8x1xf32>
    %221 = vector.broadcast %220 : vector<8x1xf32> to vector<8x32xf32>
    %222 = arith.mulf %217, %221 : vector<8x32xf32>
    %223 = vector.broadcast %8 : vector<1x32xf32> to vector<8x32xf32>
    %224 = arith.mulf %222, %223 : vector<8x32xf32>
    %225 = vector.broadcast %9 : vector<1x32xf32> to vector<8x32xf32>
    %226 = arith.addf %224, %225 : vector<8x32xf32>
    %cst_60 = arith.constant dense<0.000000e+00> : vector<8xf32>
    %227 = vector.multi_reduction <add>, %226, %cst_60 [1] : vector<8x32xf32> to vector<8xf32>
    %228 = vector.shape_cast %227 : vector<8xf32> to vector<8x1xf32>
    %cst_61 = arith.constant 3.200000e+01 : f32
    %229 = vector.broadcast %cst_61 : f32 to vector<8x1xf32>
    %230 = arith.divf %228, %229 : vector<8x1xf32>
    %231 = vector.broadcast %230 : vector<8x1xf32> to vector<8x32xf32>
    %232 = arith.subf %226, %231 : vector<8x32xf32>
    %233 = arith.mulf %232, %232 : vector<8x32xf32>
    %cst_62 = arith.constant dense<0.000000e+00> : vector<8xf32>
    %234 = vector.multi_reduction <add>, %233, %cst_62 [1] : vector<8x32xf32> to vector<8xf32>
    %235 = vector.shape_cast %234 : vector<8xf32> to vector<8x1xf32>
    %cst_63 = arith.constant 3.200000e+01 : f32
    %236 = vector.broadcast %cst_63 : f32 to vector<8x1xf32>
    %237 = arith.divf %235, %236 : vector<8x1xf32>
    %238 = vector.broadcast %230 : vector<8x1xf32> to vector<8x32xf32>
    %239 = arith.subf %226, %238 : vector<8x32xf32>
    %cst_64 = arith.constant 9.99999974E-6 : f32
    %240 = vector.broadcast %cst_64 : f32 to vector<8x1xf32>
    %241 = arith.addf %237, %240 : vector<8x1xf32>
    %242 = math.rsqrt %241 : vector<8x1xf32>
    %243 = vector.broadcast %242 : vector<8x1xf32> to vector<8x32xf32>
    %244 = arith.mulf %239, %243 : vector<8x32xf32>
    %245 = vector.broadcast %10 : vector<1x32xf32> to vector<8x32xf32>
    %246 = arith.mulf %244, %245 : vector<8x32xf32>
    %247 = vector.broadcast %11 : vector<1x32xf32> to vector<8x32xf32>
    %248 = arith.addf %246, %247 : vector<8x32xf32>
    %249 = arith.truncf %248 : vector<8x32xf32> to vector<8x32xbf16>
    %cst_65 = arith.constant dense<0.000000e+00> : vector<8x32xf32>
    %250 = tpu.matmul %249, %4, %cst_65 {dimension_numbers = #tpu.dot_dimension_numbers<[1], [0], [0], [1], [0, 0, 1, 1], [], []>} : vector<8x32xbf16>, vector<32x32xbf16>, vector<8x32xf32> -> vector<8x32xf32>
    %251 = vector.broadcast %12 : vector<1x32xf32> to vector<8x32xf32>
    %252 = arith.addf %250, %251 : vector<8x32xf32>
    %cst_66 = arith.constant dense<0.000000e+00> : vector<8x32xf32>
    %253 = tpu.matmul %249, %5, %cst_66 {dimension_numbers = #tpu.dot_dimension_numbers<[1], [0], [0], [1], [0, 0, 1, 1], [], []>} : vector<8x32xbf16>, vector<32x32xbf16>, vector<8x32xf32> -> vector<8x32xf32>
    %254 = vector.broadcast %13 : vector<1x32xf32> to vector<8x32xf32>
    %255 = arith.addf %253, %254 : vector<8x32xf32>
    %256 = math.exp %252 : vector<8x32xf32>
    %257 = arith.addf %196, %256 : vector<8x32xf32>
    %258 = arith.mulf %256, %255 : vector<8x32xf32>
    %259 = arith.addf %198, %258 : vector<8x32xf32>
    %cst_67 = arith.constant 1.000000e+00 : f32
    %260 = vector.broadcast %cst_67 : f32 to vector<8x32xf32>
    %261 = arith.addf %257, %260 : vector<8x32xf32>
    %262 = vector.extract_strided_slice %0 {offsets = [14, 0], sizes = [1, 32], strides = [1, 1]} : vector<24x128xf32> to vector<1x32xf32>
    %263 = vector.broadcast %262 : vector<1x32xf32> to vector<8x32xf32>
    %264 = arith.addf %259, %263 : vector<8x32xf32>
    %265 = tpu.reciprocal %261 {approx = true} : vector<8x32xf32> -> vector<8x32xf32>
    %266 = arith.mulf %264, %265 : vector<8x32xf32>
    %267 = arith.truncf %266 : vector<8x32xf32> to vector<8x32xbf16>
    %cst_68 = arith.constant dense<0.000000e+00> : vector<8x32xf32>
    %268 = tpu.matmul %267, %6, %cst_68 {dimension_numbers = #tpu.dot_dimension_numbers<[1], [0], [0], [1], [0, 0, 1, 1], [], []>} : vector<8x32xbf16>, vector<32x32xbf16>, vector<8x32xf32> -> vector<8x32xf32>
    %269 = vector.extract_strided_slice %0 {offsets = [6, 0], sizes = [1, 32], strides = [1, 1]} : vector<24x128xf32> to vector<1x32xf32>
    %270 = vector.broadcast %269 : vector<1x32xf32> to vector<8x32xf32>
    %271 = arith.addf %268, %270 : vector<8x32xf32>
    %272 = vector.extract_strided_slice %0 {offsets = [13, 0], sizes = [1, 32], strides = [1, 1]} : vector<24x128xf32> to vector<1x32xf32>
    %273 = vector.broadcast %272 : vector<1x32xf32> to vector<8x32xf32>
    %274 = arith.addf %273, %271 : vector<8x32xf32>
    %275 = vector.extract_strided_slice %0 {offsets = [7, 0], sizes = [1, 32], strides = [1, 1]} : vector<24x128xf32> to vector<1x32xf32>
    %276 = vector.extract_strided_slice %0 {offsets = [8, 0], sizes = [1, 32], strides = [1, 1]} : vector<24x128xf32> to vector<1x32xf32>
    %cst_69 = arith.constant dense<0.000000e+00> : vector<8xf32>
    %277 = vector.multi_reduction <add>, %274, %cst_69 [1] : vector<8x32xf32> to vector<8xf32>
    %278 = vector.shape_cast %277 : vector<8xf32> to vector<8x1xf32>
    %cst_70 = arith.constant 3.200000e+01 : f32
    %279 = vector.broadcast %cst_70 : f32 to vector<8x1xf32>
    %280 = arith.divf %278, %279 : vector<8x1xf32>
    %281 = vector.broadcast %280 : vector<8x1xf32> to vector<8x32xf32>
    %282 = arith.subf %274, %281 : vector<8x32xf32>
    %283 = arith.mulf %282, %282 : vector<8x32xf32>
    %cst_71 = arith.constant dense<0.000000e+00> : vector<8xf32>
    %284 = vector.multi_reduction <add>, %283, %cst_71 [1] : vector<8x32xf32> to vector<8xf32>
    %285 = vector.shape_cast %284 : vector<8xf32> to vector<8x1xf32>
    %cst_72 = arith.constant 3.200000e+01 : f32
    %286 = vector.broadcast %cst_72 : f32 to vector<8x1xf32>
    %287 = arith.divf %285, %286 : vector<8x1xf32>
    %288 = vector.broadcast %280 : vector<8x1xf32> to vector<8x32xf32>
    %289 = arith.subf %274, %288 : vector<8x32xf32>
    %cst_73 = arith.constant 9.99999974E-6 : f32
    %290 = vector.broadcast %cst_73 : f32 to vector<8x1xf32>
    %291 = arith.addf %287, %290 : vector<8x1xf32>
    %292 = math.rsqrt %291 : vector<8x1xf32>
    %293 = vector.broadcast %292 : vector<8x1xf32> to vector<8x32xf32>
    %294 = arith.mulf %289, %293 : vector<8x32xf32>
    %295 = vector.broadcast %275 : vector<1x32xf32> to vector<8x32xf32>
    %296 = arith.mulf %294, %295 : vector<8x32xf32>
    %297 = vector.broadcast %276 : vector<1x32xf32> to vector<8x32xf32>
    %298 = arith.addf %296, %297 : vector<8x32xf32>
    %299 = arith.truncf %298 : vector<8x32xf32> to vector<8x32xbf16>
    %cst_74 = arith.constant dense<0.000000e+00> : vector<8x128xf32>
    %300 = tpu.matmul %299, %2, %cst_74 {dimension_numbers = #tpu.dot_dimension_numbers<[1], [0], [0], [1], [0, 0, 1, 1], [], []>} : vector<8x32xbf16>, vector<32x128xbf16>, vector<8x128xf32> -> vector<8x128xf32>
    %301 = vector.extract_strided_slice %0 {offsets = [9, 0], sizes = [1, 128], strides = [1, 1]} : vector<24x128xf32> to vector<1x128xf32>
    %302 = vector.broadcast %301 : vector<1x128xf32> to vector<8x128xf32>
    %303 = arith.addf %300, %302 : vector<8x128xf32>
    %cst_75 = arith.constant 5.000000e-01 : f32
    %304 = vector.broadcast %cst_75 : f32 to vector<8x128xf32>
    %305 = arith.mulf %304, %303 : vector<8x128xf32>
    %cst_76 = arith.constant 4.471500e-02 : f32
    %306 = vector.broadcast %cst_76 : f32 to vector<8x128xf32>
    %307 = arith.mulf %306, %303 : vector<8x128xf32>
    %308 = arith.mulf %307, %303 : vector<8x128xf32>
    %309 = arith.mulf %308, %303 : vector<8x128xf32>
    %310 = arith.addf %303, %309 : vector<8x128xf32>
    %cst_77 = arith.constant 0.797884583 : f32
    %311 = vector.broadcast %cst_77 : f32 to vector<8x128xf32>
    %312 = arith.mulf %311, %310 : vector<8x128xf32>
    %313 = math.tanh %312 : vector<8x128xf32>
    %cst_78 = arith.constant 1.000000e+00 : f32
    %314 = vector.broadcast %cst_78 : f32 to vector<8x128xf32>
    %315 = arith.addf %314, %313 : vector<8x128xf32>
    %316 = arith.mulf %305, %315 : vector<8x128xf32>
    %317 = arith.truncf %316 : vector<8x128xf32> to vector<8x128xbf16>
    %c0_79 = arith.constant 0 : index
    %c0_80 = arith.constant 0 : index
    %318 = vector.load %arg4[%c0_79, %c0_80] : memref<128x32xbf16, #tpu.memory_space<vmem>>, vector<128x32xbf16>
    %cst_81 = arith.constant dense<0.000000e+00> : vector<8x32xf32>
    %319 = tpu.matmul %317, %318, %cst_81 {dimension_numbers = #tpu.dot_dimension_numbers<[1], [0], [0], [1], [0, 0, 1, 1], [], []>} : vector<8x128xbf16>, vector<128x32xbf16>, vector<8x32xf32> -> vector<8x32xf32>
    %320 = vector.extract_strided_slice %0 {offsets = [10, 0], sizes = [1, 32], strides = [1, 1]} : vector<24x128xf32> to vector<1x32xf32>
    %321 = vector.broadcast %320 : vector<1x32xf32> to vector<8x32xf32>
    %322 = arith.addf %319, %321 : vector<8x32xf32>
    %323 = arith.addf %274, %322 : vector<8x32xf32>
    %324 = vector.extract_strided_slice %0 {offsets = [11, 0], sizes = [1, 32], strides = [1, 1]} : vector<24x128xf32> to vector<1x32xf32>
    %325 = vector.extract_strided_slice %0 {offsets = [12, 0], sizes = [1, 32], strides = [1, 1]} : vector<24x128xf32> to vector<1x32xf32>
    %cst_82 = arith.constant dense<0.000000e+00> : vector<8xf32>
    %326 = vector.multi_reduction <add>, %323, %cst_82 [1] : vector<8x32xf32> to vector<8xf32>
    %327 = vector.shape_cast %326 : vector<8xf32> to vector<8x1xf32>
    %cst_83 = arith.constant 3.200000e+01 : f32
    %328 = vector.broadcast %cst_83 : f32 to vector<8x1xf32>
    %329 = arith.divf %327, %328 : vector<8x1xf32>
    %330 = vector.broadcast %329 : vector<8x1xf32> to vector<8x32xf32>
    %331 = arith.subf %323, %330 : vector<8x32xf32>
    %332 = arith.mulf %331, %331 : vector<8x32xf32>
    %cst_84 = arith.constant dense<0.000000e+00> : vector<8xf32>
    %333 = vector.multi_reduction <add>, %332, %cst_84 [1] : vector<8x32xf32> to vector<8xf32>
    %334 = vector.shape_cast %333 : vector<8xf32> to vector<8x1xf32>
    %cst_85 = arith.constant 3.200000e+01 : f32
    %335 = vector.broadcast %cst_85 : f32 to vector<8x1xf32>
    %336 = arith.divf %334, %335 : vector<8x1xf32>
    %337 = vector.broadcast %329 : vector<8x1xf32> to vector<8x32xf32>
    %338 = arith.subf %323, %337 : vector<8x32xf32>
    %cst_86 = arith.constant 9.99999974E-6 : f32
    %339 = vector.broadcast %cst_86 : f32 to vector<8x1xf32>
    %340 = arith.addf %336, %339 : vector<8x1xf32>
    %341 = math.rsqrt %340 : vector<8x1xf32>
    %342 = vector.broadcast %341 : vector<8x1xf32> to vector<8x32xf32>
    %343 = arith.mulf %338, %342 : vector<8x32xf32>
    %344 = vector.broadcast %324 : vector<1x32xf32> to vector<8x32xf32>
    %345 = arith.mulf %343, %344 : vector<8x32xf32>
    %346 = vector.broadcast %325 : vector<1x32xf32> to vector<8x32xf32>
    %347 = arith.addf %345, %346 : vector<8x32xf32>
    %348 = arith.truncf %347 : vector<8x32xf32> to vector<8x32xbf16>
    %cst_87 = arith.constant dense<0.000000e+00> : vector<8x128xf32>
    %349 = tpu.matmul %348, %3, %cst_87 {dimension_numbers = #tpu.dot_dimension_numbers<[1], [0], [0], [1], [0, 0, 1, 1], [], []>} : vector<8x32xbf16>, vector<32x128xbf16>, vector<8x128xf32> -> vector<8x128xf32>
    %c0_88 = arith.constant 0 : index
    %c0_89 = arith.constant 0 : index
    %350 = vector.load %arg6[%c0_88, %c0_89] : memref<8x128xf32, #tpu.memory_space<vmem>>, vector<8x128xf32>
    tpu.vector_store %arg6[%c0_88, %c0_89], %349 {strides = array<i32>} : memref<8x128xf32, #tpu.memory_space<vmem>>, vector<8x128xf32>,
    return
  }
  func.func @transform_0(%arg0: i32) -> (i32, i32, i32) {
    %c0_i32 = arith.constant 0 : i32
    %c0_i32_0 = arith.constant 0 : i32
    %c0_i32_1 = arith.constant 0 : i32
    return %c0_i32, %arg0, %c0_i32_0 : i32, i32, i32
  }
  func.func @transform_1(%arg0: i32) -> (i32, i32) {
    %c0_i32 = arith.constant 0 : i32
    %c0_i32_0 = arith.constant 0 : i32
    %c0_i32_1 = arith.constant 0 : i32
    return %c0_i32, %c0_i32_0 : i32, i32
  }
  func.func @transform_2(%arg0: i32) -> (i32, i32) {
    %c0_i32 = arith.constant 0 : i32
    %c0_i32_0 = arith.constant 0 : i32
    %c0_i32_1 = arith.constant 0 : i32
    return %c0_i32, %c0_i32_0 : i32, i32
  }
  func.func @transform_3(%arg0: i32) -> (i32, i32) {
    %c0_i32 = arith.constant 0 : i32
    %c0_i32_0 = arith.constant 0 : i32
    %c0_i32_1 = arith.constant 0 : i32
    return %c0_i32, %c0_i32_0 : i32, i32
  }
  func.func @transform_4(%arg0: i32) -> (i32, i32) {
    %c0_i32 = arith.constant 0 : i32
    %c0_i32_0 = arith.constant 0 : i32
    %c0_i32_1 = arith.constant 0 : i32
    return %c0_i32, %c0_i32_0 : i32, i32
  }
  func.func @transform_5(%arg0: i32) -> (i32, i32) {
    %c0_i32 = arith.constant 0 : i32
    %c0_i32_0 = arith.constant 0 : i32
    return %arg0, %c0_i32 : i32, i32
  }
}

</mosaic_0001>

<bundles_post_ra>
// kernel: mul.20
= control target key start
LH: loop header
LB: loop body
LE: loop exit
PB: predicated region body
PF: predicated region fallthrough
CT: control target
= control target key end

     0   :  { %s34_s0 = inlined_call_operand.vmem [shape: f32[192], index: 0, kind: input, shape index: {}]   ;;  %s35_s1 = inlined_call_operand.vmem [shape: f32[192], index: 1, kind: input, shape index: {}]   ;;  %s36_s2 = inlined_call_operand.vmem [shape: f32[192], index: 2, kind: output, shape index: {}]  }
   0x1   :  { %v3_v0 = vld [vmem:[%s34_s0] sm:$0x3] }
   0x2   :  { %v4_v1 = vld [vmem:[%s35_s1] sm:$0x3] }
   0x3   :  { %v7_v2 = vmul.f32 %v4_v1, %v3_v0 }
   0x5   :  { %9 = vst [vmem:[%s36_s2] sm:$0x3] %v7_v2 }

// kernel: frozen_openclip_image_prediction_embedder.1
= control target key start
LH: loop header
LB: loop body
LE: loop exit
PB: predicated region body
PF: predicated region fallthrough
CT: control target
= control target key end

     0   :  { %v1493_v0 = vmov 0   ;;  %vm139_vm0 = vcmask 523264   ;;  %v57_v16 = vlaneseq  ;;  %vm183_vm1 = vcmask 261120   ;;  %s1494_s24 = smov 96   ;;  %s1994_s1 = inlined_call_operand.vmem [shape: bf16[192,32], index: 1, kind: input, shape index: {}]   ;;  %s1995_s0 = inlined_call_operand.vmem [shape: bf16[4,8,192], index: 0, kind: input, shape index: {}]   ;;  %s1996_s4 = inlined_call_operand.vmem [shape: f32[24,128], index: 4, kind: input, shape index: {}]   ;;  %s1997_s2 = inlined_call_operand.vmem [shape: bf16[32,352], index: 2, kind: input, shape index: {}]   ;;  %s1998_s3 = inlined_call_operand.vmem [shape: bf16[128,32], index: 3, kind: input, shape index: {}]   ;;  %s1999_s5 = inlined_call_operand.vmem [shape: f32[8,128], index: 5, kind: output, shape index: {}]  }
   0x1   :  { %143 = vmatprep.subr.bf16.mxu0 %v1493_v0  ;;  %v1532_v1 = vld [vmem:[%s1994_s1] sm:$0xff]   ;;  %v1538_v2 = vld [vmem:[%s1994_s1 + $0x8] sm:$0xff]   ;;  %v1545_v3 = vld [vmem:[%s1994_s1 + $0x10] sm:$0xff]   ;;  %v1495_v53 = vmov 0.0   ;;  %vm1496_vm2 = vmmov 0  }
   0x2   :  { %144 = vmatpush1.bf16.msra.mxu0 %v1532_v1  ;;  %v1552_v4 = vld [vmem:[%s1994_s1 + $0x18] sm:$0xff]   ;;  %v56_v5 = vld [vmem:[%s1995_s0] sm:$0xff]  ;;  %v1570_v8 = vld [vmem:[%s1994_s1 + $0x28] sm:$0xff]   ;;  %v1616_v17 = vshrl.u32 %v57_v16, 7  ;;  %1311 = vmatprep.subr.bf16.mxu1 %v1495_v53 }
   0x3   :  { %145 = vmatprep.subr.bf16.mxu0 %v1493_v0  ;;  %v1218_v6 = vcombine.high %v56_v5, %v56_v5  ;;  %v1562_v7 = vld [vmem:[%s1994_s1 + $0x20] sm:$0xff]   ;;  %v1577_v9 = vld [vmem:[%s1994_s1 + $0x30] sm:$0xff]   ;;  %v1584_v10 = vld [vmem:[%s1994_s1 + $0x38] sm:$0xff]   ;;  %v1217_v15 = vcombine.low %v56_v5, %v56_v5  ;;  %1315 = vmatprep.mubr.msk.bf16.mxu1 %vm1496_vm2, %v1495_v53 }
   0x4   :  { %v1591_v11 = vld [vmem:[%s1994_s1 + $0x40] sm:$0xff]   ;;  %v1598_v12 = vld [vmem:[%s1994_s1 + $0x48] sm:$0xff]   ;;  %v1605_v13 = vld [vmem:[%s1994_s1 + $0x50] sm:$0xff]   ;;  %v59_v18 = vsub.s32 7, %v1616_v17  ;;  %v1630_v35 = vsub.s32 0, %v1616_v17  ;;  %v1638_v37 = vsub.s32 1, %v1616_v17 }
   0x5   :  { %1231 = vmatprep.mubr.msk.bf16.mxu0 %vm139_vm0, %v1218_v6  ;;  %v1612_v14 = vld [vmem:[%s1994_s1 + $0x58] sm:$0xff]   ;;  %v1622_v19 = vld [vmem:[%s1996_s4 + $0x8] sm:$0xff]  ;;  %v1635_v36 = vld [vmem:[%s1996_s4] sm:$0xff]  ;;  %v1683_v58 = vsub.s32 2, %v1616_v17  ;;  %v228_v59 = vsub.s32 3, %v1616_v17 }
   0x6   :  { %146 = vmatpush1.bf16.msra.mxu0 %v1538_v2  ;;  %v60_v20 = vrot.slane %v1622_v19, %v59_v18  ;;  %v1642_v38 = vrot.slane %v1635_v36, %v1630_v35  ;;  %v1646_v41 = vrot.slane %v1635_v36, %v1638_v37  ;;  %v1654_v45 = vld [vmem:[%s1997_s2 + $0x8] ss:$12 sps:$4 sm:$0xff]   ;;  %v1661_v51 = vld [vmem:[%s1997_s2 + $0x20] ss:$12 sps:$4 sm:$0xff]  }
   0x7   :  { %147 = vmatprep.subr.bf16.mxu0 %v1493_v0  ;;  %1312 = vmatpush3.bf16.msra.mxu1 %v1654_v45  ;;  %v1688_v60 = vrot.slane %v1635_v36, %v1683_v58  ;;  %v1693_v63 = vrot.slane %v1635_v36, %v228_v59  ;;  %v1236_v16 = vld [vmem:[%s1995_s0 + $0x8] sm:$0xff] }
   0x8   :  { %1313 = vmatprep.subr.bf16.mxu1 %v1495_v53 }
   0xa   :  { %148 = vmatpush1.bf16.msra.mxu0 %v1545_v3 }
   0xb   :  { %149 = vmatprep.subr.bf16.mxu0 %v1493_v0  ;;  %1314 = vmatpush3.bf16.msra.mxu1 %v1661_v51 }
   0xc   :  { %1319 = vmatprep.subr.bf16.mxu1 %v1495_v53 }
   0xe   :  { %150 = vmatpush1.bf16.msra.mxu0 %v1552_v4 }
   0xf   :  { %151 = vmatprep.subr.bf16.mxu0 %v1493_v0 }
  0x12   :  { %152 = vmatpush1.bf16.msra.mxu0 %v1562_v7 }
  0x13   :  { %153 = vmatprep.subr.bf16.mxu0 %v1493_v0 }
  0x16   :  { %154 = vmatpush1.bf16.msra.mxu0 %v1570_v8 }
  0x17   :  { %155 = vmatprep.subr.bf16.mxu0 %v1493_v0 }
  0x1a   :  { %156 = vmatpush1.bf16.msra.mxu0 %v1577_v9 }
  0x1b   :  { %157 = vmatprep.subr.bf16.mxu0 %v1493_v0 }
  0x1e   :  { %158 = vmatpush1.bf16.msra.mxu0 %v1584_v10 }
  0x1f   :  { %159 = vmatprep.subr.bf16.mxu0 %v1493_v0 }
  0x22   :  { %160 = vmatpush1.bf16.msra.mxu0 %v1591_v11 }
  0x23   :  { %161 = vmatprep.subr.bf16.mxu0 %v1493_v0 }
  0x26   :  { %162 = vmatpush1.bf16.msra.mxu0 %v1598_v12 }
  0x27   :  { %163 = vmatprep.subr.bf16.mxu0 %v1493_v0 }
  0x2a   :  { %164 = vmatpush1.bf16.msra.mxu0 %v1605_v13 }
  0x2b   :  { %165 = vmatprep.subr.bf16.mxu0 %v1493_v0 }
  0x2e   :  { %166 = vmatpush1.bf16.msra.mxu0 %v1612_v14 }
  0x2f   :  { %1335 = vmatprep.subr.bf16.mxu0 %v1495_v53 }
  0x31   :  { %176 = vmatmul.mubr.bf16.vlgmr.msra.gmra.mrb[0].mxu0 %v1217_v15 }
  0x32   :  { %1339 = vmatprep.mubr.msk.bf16.mxu0 %vm1496_vm2, %v1495_v53 }
 0x104   :  { %v177_v21 = vpop.f32.mrb[0].mxu0 }
 0x105   :  { %v178_v22 = vadd.f32 %v177_v21, %v60_v20  ;;  %v179_v23 = vpop.f32.mrb[1].mxu0  ;;  %v1238_v20 = vcombine.high %v1236_v16, %v1236_v16  ;;  %v1237_v21 = vcombine.low %v1236_v16, %v1236_v16 }
 0x106   :  { %v180_v24 = vpop.f32.mrb[2].mxu0 }
 0x107   :  { %v181_v25 = vpop.f32.mrb[3].mxu0  ;;  %v184_v26 = vsel %vm183_vm1, %v178_v22, 0.0 }
 0x108   :  { %185 = vadd.xlane.f32.xlu0 %v184_v26 }
 0x195   :  { %v186_v27 = vpop.xlane.xlu0 %185 }
 0x196   :  { %v188_v28 = vmul.f32 0.03125, %v186_v27 }
 0x198   :  { %v189_v29 = vsub.f32 %v178_v22, %v188_v28  ;;  %v234_v22 = vsub.s32 4, %v1616_v17 }
 0x19a   :  { %v190_v30 = vmul.f32 %v189_v29, %v189_v29  ;;  %v1743_v23 = vrot.slane %v1635_v36, %v234_v22 }
 0x19c   :  { %v191_v31 = vsel %vm183_vm1, %v190_v30, 0.0  ;;  %v293_v30 = vsub.s32 5, %v1616_v17 }
 0x19d   :  { %192 = vadd.xlane.f32.xlu0 %v191_v31 }
 0x1b3   :  { %295 = vrot.lane.b32.xlu0 %v1654_v45, %s1494_s24 }
 0x22a   :  { %v193_v32 = vpop.xlane.xlu0 %192 }
 0x22b   :  { %v194_v33 = vmul.f32 0.03125, %v193_v32 }
 0x22d   :  { %v195_v34 = vadd.f32 1e-05, %v194_v33  ;;  %v1750_v33 = vrot.slane %v1635_v36, %v293_v30 }
 0x22e   :  { %v1664_v52 = vpop.permute.xlu0 %295 }
 0x22f   :  { %1460 = vrsqrt.f32 %v195_v34  ;;  %1336 = vmatpush3.bf16.msra.mxu0 %v1664_v52 }
 0x230   :  { %1337 = vmatprep.subr.bf16.mxu0 %v1495_v53 }
 0x239   :  { %v1461_v39 = vpop.eup %1460 }
 0x23a   :  { %v197_v40 = vmul.f32 %v1461_v39, %v189_v29 }
 0x23c   :  { %v202_v42 = vmul.f32 %v1642_v38, %v197_v40 }
 0x23e   :  { %v207_v43 = vadd.f32 %v1646_v41, %v202_v42 }
 0x240   :  { %v208_v44 = vsel %vm183_vm1, %v207_v43, 0.0 }
 0x241   :  { %209 = vadd.xlane.f32.xlu1 %v208_v44  ;;  %v1761_v44 = vld [vmem:[%s1996_s4 + $0x10] sm:$0xff] }
 0x2ce   :  { %v210_v46 = vpop.xlane.xlu1 %209 }
 0x2cf   :  { %v211_v47 = vmul.f32 0.03125, %v210_v46  ;;  %v351_v46 = vrot.slane %v1761_v44, %v1630_v35 }
 0x2d1   :  { %v212_v48 = vsub.f32 %v207_v43, %v211_v47 }
 0x2d3   :  { %v213_v49 = vmul.f32 %v212_v48, %v212_v48 }
 0x2d5   :  { %v214_v50 = vsel %vm183_vm1, %v213_v49, 0.0 }
 0x2d6   :  { %215 = vadd.xlane.f32.xlu1 %v214_v50 }
 0x2e7   :  { %297 = vrot.lane.b32.xlu1 %v1661_v51, %s1494_s24 }
 0x363   :  { %v216_v54 = vpop.xlane.xlu1 %215 }
 0x364   :  { %v217_v55 = vmul.f32 0.03125, %v216_v54 }
 0x366   :  { %v218_v56 = vadd.f32 1e-05, %v217_v55 }
 0x367   :  { %v1678_v57 = vpop.permute.xlu1 %297 }
 0x368   :  { %1462 = vrsqrt.f32 %v218_v56  ;;  %1338 = vmatpush3.bf16.msra.mxu0 %v1678_v57 }
 0x369   :  { %535 = vmatprep.subr.bf16.mxu0 %v1493_v0 }
 0x372   :  { %v1463_v61 = vpop.eup %1462 }
 0x373   :  { %v220_v62 = vmul.f32 %v1463_v61, %v212_v48 }
 0x375   :  { %v225_v5 = vmul.f32 %v1688_v60, %v220_v62 }
 0x377   :  { %v230_v6 = vadd.f32 %v1693_v63, %v225_v5 }
 0x379   :  { %v231_v15 = vpack.c.bf16 %v230_v6, %v230_v6 }
 0x37b   :  { %1316 = vmatmul.mubr.msk.bf16.vlgmr.msra.gmra.mrb[0].mxu1 %vm183_vm1, %v231_v15 }
 0x37c   :  { %1320 = vmatpush3.bf16.msra.mxu1 %v1664_v52  ;;  %1323 = vmatprep.mubr.msk.bf16.mxu1 %vm1496_vm2, %v1495_v53 }
 0x37d   :  { %1321 = vmatprep.subr.bf16.mxu1 %v1495_v53 }
 0x380   :  { %1322 = vmatpush3.bf16.msra.mxu1 %v1678_v57 }
 0x381   :  { %361 = vmatprep.subr.bf16.mxu1 %v1493_v0 }
 0x383   :  { %1324 = vmatmul.mubr.msk.bf16.vlgmr.msra.gmra.mrb[4].mxu1 %vm183_vm1, %v231_v15 }
 0x384   :  { %362 = vmatpush1.bf16.msra.mxu1 %v1532_v1  ;;  %1239 = vmatprep.mubr.msk.bf16.mxu1 %vm139_vm0, %v1238_v20 }
 0x385   :  { %363 = vmatprep.subr.bf16.mxu1 %v1493_v0 }
 0x388   :  { %364 = vmatpush1.bf16.msra.mxu1 %v1538_v2 }
 0x389   :  { %365 = vmatprep.subr.bf16.mxu1 %v1493_v0 }
 0x38c   :  { %366 = vmatpush1.bf16.msra.mxu1 %v1545_v3 }
 0x38d   :  { %367 = vmatprep.subr.bf16.mxu1 %v1493_v0 }
 0x390   :  { %368 = vmatpush1.bf16.msra.mxu1 %v1552_v4 }
 0x391   :  { %369 = vmatprep.subr.bf16.mxu1 %v1493_v0 }
 0x394   :  { %370 = vmatpush1.bf16.msra.mxu1 %v1562_v7 }
 0x395   :  { %371 = vmatprep.subr.bf16.mxu1 %v1493_v0 }
 0x398   :  { %372 = vmatpush1.bf16.msra.mxu1 %v1570_v8 }
 0x399   :  { %373 = vmatprep.subr.bf16.mxu1 %v1493_v0 }
 0x39c   :  { %374 = vmatpush1.bf16.msra.mxu1 %v1577_v9 }
 0x39d   :  { %375 = vmatprep.subr.bf16.mxu1 %v1493_v0 }
 0x3a0   :  { %376 = vmatpush1.bf16.msra.mxu1 %v1584_v10 }
 0x3a1   :  { %377 = vmatprep.subr.bf16.mxu1 %v1493_v0 }
 0x3a4   :  { %378 = vmatpush1.bf16.msra.mxu1 %v1591_v11 }
 0x3a5   :  { %379 = vmatprep.subr.bf16.mxu1 %v1493_v0 }
 0x3a8   :  { %380 = vmatpush1.bf16.msra.mxu1 %v1598_v12 }
 0x3a9   :  { %381 = vmatprep.subr.bf16.mxu1 %v1493_v0 }
 0x3ac   :  { %382 = vmatpush1.bf16.msra.mxu1 %v1605_v13 }
 0x3ad   :  { %383 = vmatprep.subr.bf16.mxu1 %v1493_v0 }
 0x3b0   :  { %384 = vmatpush1.bf16.msra.mxu1 %v1612_v14 }
 0x3b1   :  { %1327 = vmatprep.subr.bf16.mxu1 %v1495_v53 }
 0x3b3   :  { %394 = vmatmul.mubr.bf16.vlgmr.msra.gmra.mrb[8].mxu1 %v1237_v21 }
 0x3b4   :  { %1328 = vmatpush3.bf16.msra.mxu1 %v1654_v45  ;;  %1331 = vmatprep.mubr.msk.bf16.mxu1 %vm1496_vm2, %v1495_v53 }
 0x3b5   :  { %1329 = vmatprep.subr.bf16.mxu1 %v1495_v53 }
 0x3b8   :  { %1330 = vmatpush3.bf16.msra.mxu1 %v1661_v51 }
 0x3b9   :  { %1343 = vmatprep.subr.bf16.mxu1 %v1495_v53 }
 0x44e   :  { %v285_v24 = vpop.f32.mrb[0].mxu1 }
 0x44f   :  { %v286_v25 = vadd.f32 %v285_v24, %v1743_v23  ;;  %v1317_v26 = vpop.f32.mrb[1].mxu1 }
 0x450   :  { %v288_v27 = vpop.f32.mrb[2].mxu1 }
 0x451   :  { %v341_v28 = vmul.f32 1.442695, %v286_v25  ;;  %v1318_v29 = vpop.f32.mrb[3].mxu1 }
 0x453   :  { %1464 = vpow2.f32 %v341_v28 }
 0x456   :  { %v335_v31 = vpop.f32.mrb[4].mxu1 }
 0x457   :  { %v1325_v32 = vpop.f32.mrb[5].mxu1  ;;  %v336_v40 = vadd.f32 %v335_v31, %v1750_v33 }
 0x458   :  { %v338_v34 = vpop.f32.mrb[6].mxu1 }
 0x459   :  { %v1326_v39 = vpop.f32.mrb[7].mxu1 }
 0x45d   :  { %v1753_v42 = vpop.eup %1464 }
 0x45e   :  { %v1756_v43 = vmul.f32 %v1753_v42, %v336_v40 }
 0x486   :  { %v395_v47 = vpop.f32.mrb[8].mxu1 }
 0x487   :  { %v396_v48 = vadd.f32 %v395_v47, %v351_v46  ;;  %v397_v49 = vpop.f32.mrb[9].mxu1 }
 0x488   :  { %v398_v50 = vpop.f32.mrb[10].mxu1 }
 0x489   :  { %v399_v54 = vpop.f32.mrb[11].mxu1  ;;  %v401_v55 = vsel %vm183_vm1, %v396_v48, 0.0  ;;  %v1242_v50 = vld [vmem:[%s1995_s0 + $0x10] sm:$0xff] }
 0x48a   :  { %402 = vadd.xlane.f32.xlu1 %v401_v55  ;;  %v1244_v55 = vcombine.high %v1242_v50, %v1242_v50 }
 0x517   :  { %v403_v56 = vpop.xlane.xlu1 %402 }
 0x518   :  { %v404_v61 = vmul.f32 0.03125, %v403_v56 }
 0x51a   :  { %v405_v62 = vsub.f32 %v396_v48, %v404_v61  ;;  %v1243_v61 = vcombine.low %v1242_v50, %v1242_v50 }
 0x51c   :  { %v406_v5 = vmul.f32 %v405_v62, %v405_v62 }
 0x51e   :  { %v407_v6 = vsel %vm183_vm1, %v406_v5, 0.0 }
 0x51f   :  { %408 = vadd.xlane.f32.xlu0 %v407_v6 }
 0x5ac   :  { %v409_v15 = vpop.xlane.xlu0 %408 }
 0x5ad   :  { %v410_v16 = vmul.f32 0.03125, %v409_v15 }
 0x5af   :  { %v411_v20 = vadd.f32 1e-05, %v410_v16 }
 0x5b1   :  { %1466 = vrsqrt.f32 %v411_v20 }
 0x5bb   :  { %v1467_v21 = vpop.eup %1466 }
 0x5bc   :  { %v413_v24 = vmul.f32 %v1467_v21, %v405_v62 }
 0x5be   :  { %v414_v25 = vmul.f32 %v413_v24, %v1642_v38 }
 0x5c0   :  { %v415_v26 = vadd.f32 %v414_v25, %v1646_v41 }
 0x5c2   :  { %v416_v27 = vsel %vm183_vm1, %v415_v26, 0.0 }
 0x5c3   :  { %417 = vadd.xlane.f32.xlu0 %v416_v27 }
 0x650   :  { %v418_v28 = vpop.xlane.xlu0 %417 }
 0x651   :  { %v419_v29 = vmul.f32 0.03125, %v418_v28 }
 0x653   :  { %v420_v31 = vsub.f32 %v415_v26, %v419_v29 }
 0x655   :  { %v421_v32 = vmul.f32 %v420_v31, %v420_v31 }
 0x657   :  { %v422_v34 = vsel %vm183_vm1, %v421_v32, 0.0 }
 0x658   :  { %423 = vadd.xlane.f32.xlu1 %v422_v34  ;;  %v525_v34 = vrot.slane %v1761_v44, %v1638_v37 }
 0x6e5   :  { %v424_v39 = vpop.xlane.xlu1 %423 }
 0x6e6   :  { %v425_v40 = vmul.f32 0.03125, %v424_v39 }
 0x6e8   :  { %v426_v46 = vadd.f32 1e-05, %v425_v40 }
 0x6ea   :  { %1468 = vrsqrt.f32 %v426_v46 }
 0x6f4   :  { %v1469_v47 = vpop.eup %1468 }
 0x6f5   :  { %v428_v48 = vmul.f32 %v1469_v47, %v420_v31 }
 0x6f7   :  { %v429_v49 = vmul.f32 %v428_v48, %v1688_v60 }
 0x6f9   :  { %v430_v54 = vadd.f32 %v429_v49, %v1693_v63 }
 0x6fb   :  { %v431_v56 = vpack.c.bf16 %v430_v54, %v430_v54 }
 0x6fd   :  { %1332 = vmatmul.mubr.msk.bf16.vlgmr.msra.gmra.mrb[12].mxu1 %vm183_vm1, %v431_v56  ;;  %1340 = vmatmul.mubr.msk.bf16.vlgmr.msra.gmra.mrb[4].mxu0 %vm183_vm1, %v431_v56 }
 0x6fe   :  { %536 = vmatpush1.bf16.msra.mxu0 %v1532_v1  ;;  %1245 = vmatprep.mubr.msk.bf16.mxu0 %vm139_vm0, %v1244_v55 }
 0x6ff   :  { %537 = vmatprep.subr.bf16.mxu0 %v1493_v0  ;;  %1344 = vmatpush3.bf16.msra.mxu1 %v1654_v45 }
 0x700   :  { %1345 = vmatprep.subr.bf16.mxu1 %v1495_v53  ;;  %1347 = vmatprep.mubr.msk.bf16.mxu1 %vm1496_vm2, %v1495_v53 }
 0x702   :  { %538 = vmatpush1.bf16.msra.mxu0 %v1538_v2 }
 0x703   :  { %539 = vmatprep.subr.bf16.mxu0 %v1493_v0  ;;  %1346 = vmatpush3.bf16.msra.mxu1 %v1661_v51 }
 0x704   :  { %1351 = vmatprep.subr.bf16.mxu1 %v1495_v53 }
 0x706   :  { %540 = vmatpush1.bf16.msra.mxu0 %v1545_v3 }
 0x707   :  { %541 = vmatprep.subr.bf16.mxu0 %v1493_v0 }
 0x70a   :  { %542 = vmatpush1.bf16.msra.mxu0 %v1552_v4 }
 0x70b   :  { %543 = vmatprep.subr.bf16.mxu0 %v1493_v0 }
 0x70e   :  { %544 = vmatpush1.bf16.msra.mxu0 %v1562_v7 }
 0x70f   :  { %545 = vmatprep.subr.bf16.mxu0 %v1493_v0 }
 0x712   :  { %546 = vmatpush1.bf16.msra.mxu0 %v1570_v8 }
 0x713   :  { %547 = vmatprep.subr.bf16.mxu0 %v1493_v0 }
 0x716   :  { %548 = vmatpush1.bf16.msra.mxu0 %v1577_v9 }
 0x717   :  { %549 = vmatprep.subr.bf16.mxu0 %v1493_v0 }
 0x71a   :  { %550 = vmatpush1.bf16.msra.mxu0 %v1584_v10 }
 0x71b   :  { %551 = vmatprep.subr.bf16.mxu0 %v1493_v0 }
 0x71e   :  { %552 = vmatpush1.bf16.msra.mxu0 %v1591_v11 }
 0x71f   :  { %553 = vmatprep.subr.bf16.mxu0 %v1493_v0 }
 0x722   :  { %554 = vmatpush1.bf16.msra.mxu0 %v1598_v12 }
 0x723   :  { %555 = vmatprep.subr.bf16.mxu0 %v1493_v0 }
 0x726   :  { %556 = vmatpush1.bf16.msra.mxu0 %v1605_v13 }
 0x727   :  { %557 = vmatprep.subr.bf16.mxu0 %v1493_v0 }
 0x72a   :  { %558 = vmatpush1.bf16.msra.mxu0 %v1612_v14 }
 0x72b   :  { %1359 = vmatprep.subr.bf16.mxu0 %v1495_v53 }
 0x72d   :  { %568 = vmatmul.mubr.bf16.vlgmr.msra.gmra.mrb[8].mxu0 %v1243_v61 }
 0x72e   :  { %1360 = vmatpush3.bf16.msra.mxu0 %v1654_v45  ;;  %1363 = vmatprep.mubr.msk.bf16.mxu0 %vm1496_vm2, %v1495_v53 }
 0x72f   :  { %1361 = vmatprep.subr.bf16.mxu0 %v1495_v53 }
 0x732   :  { %1362 = vmatpush3.bf16.msra.mxu0 %v1661_v51 }
 0x733   :  { %1367 = vmatprep.subr.bf16.mxu0 %v1495_v53 }
 0x7d0   :  { %v469_v62 = vpop.f32.mrb[12].mxu1  ;;  %v509_v5 = vpop.f32.mrb[4].mxu0 }
 0x7d1   :  { %v470_v6 = vadd.f32 %v469_v62, %v1743_v23  ;;  %v1333_v15 = vpop.f32.mrb[13].mxu1  ;;  %v1341_v16 = vpop.f32.mrb[5].mxu0  ;;  %v510_v27 = vadd.f32 %v509_v5, %v1750_v33 }
 0x7d2   :  { %v472_v20 = vpop.f32.mrb[14].mxu1  ;;  %v512_v21 = vpop.f32.mrb[6].mxu0 }
 0x7d3   :  { %v515_v24 = vmul.f32 1.442695, %v470_v6  ;;  %v1334_v25 = vpop.f32.mrb[15].mxu1  ;;  %v1342_v26 = vpop.f32.mrb[7].mxu0 }
 0x7d5   :  { %1470 = vpow2.f32 %v515_v24 }
 0x7df   :  { %v1471_v28 = vpop.eup %1470 }
 0x7e0   :  { %v1818_v29 = vadd.f32 %v1471_v28, %v1753_v42  ;;  %v518_v31 = vmul.f32 %v1471_v28, %v510_v27 }
 0x7e2   :  { %v1821_v32 = vadd.f32 %v518_v31, %v1756_v43 }
 0x800   :  { %v569_v39 = vpop.f32.mrb[8].mxu0 }
 0x801   :  { %v570_v40 = vadd.f32 %v569_v39, %v525_v34  ;;  %v571_v46 = vpop.f32.mrb[9].mxu0 }
 0x802   :  { %v572_v47 = vpop.f32.mrb[10].mxu0 }
 0x803   :  { %v573_v48 = vpop.f32.mrb[11].mxu0  ;;  %v575_v49 = vsel %vm183_vm1, %v570_v40, 0.0 }
 0x804   :  { %576 = vadd.xlane.f32.xlu0 %v575_v49  ;;  %v1248_v49 = vld [vmem:[%s1995_s0 + $0x18] sm:$0xff]  ;;  %s1497_s0 = smov 64  }
 0x891   :  { %v577_v50 = vpop.xlane.xlu0 %576 }
 0x892   :  { %v578_v54 = vmul.f32 0.03125, %v577_v50  ;;  %v1250_v50 = vcombine.high %v1248_v49, %v1248_v49 }
 0x894   :  { %v579_v55 = vsub.f32 %v570_v40, %v578_v54 }
 0x896   :  { %v580_v42 = vmul.f32 %v579_v55, %v579_v55 }
 0x898   :  { %v581_v56 = vsel %vm183_vm1, %v580_v42, 0.0 }
 0x899   :  { %582 = vadd.xlane.f32.xlu1 %v581_v56  ;;  %v699_v56 = vrot.slane %v1761_v44, %v1683_v58 }
 0x926   :  { %v583_v43 = vpop.xlane.xlu1 %582 }
 0x927   :  { %v584_v61 = vmul.f32 0.03125, %v583_v43 }
 0x929   :  { %v585_v62 = vadd.f32 1e-05, %v584_v61 }
 0x92b   :  { %1472 = vrsqrt.f32 %v585_v62 }
 0x935   :  { %v1473_v5 = vpop.eup %1472 }
 0x936   :  { %v587_v6 = vmul.f32 %v1473_v5, %v579_v55 }
 0x938   :  { %v588_v15 = vmul.f32 %v587_v6, %v1642_v38 }
 0x93a   :  { %v589_v16 = vadd.f32 %v588_v15, %v1646_v41 }
 0x93c   :  { %v590_v20 = vsel %vm183_vm1, %v589_v16, 0.0 }
 0x93d   :  { %591 = vadd.xlane.f32.xlu0 %v590_v20 }
 0x9ca   :  { %v592_v21 = vpop.xlane.xlu0 %591 }
 0x9cb   :  { %v593_v24 = vmul.f32 0.03125, %v592_v21 }
 0x9cd   :  { %v594_v25 = vsub.f32 %v589_v16, %v593_v24 }
 0x9cf   :  { %v595_v26 = vmul.f32 %v594_v25, %v594_v25 }
 0x9d1   :  { %v596_v27 = vsel %vm183_vm1, %v595_v26, 0.0 }
 0x9d2   :  { %597 = vadd.xlane.f32.xlu1 %v596_v27 }
 0xa5f   :  { %v598_v28 = vpop.xlane.xlu1 %597 }
 0xa60   :  { %v599_v31 = vmul.f32 0.03125, %v598_v28 }
 0xa62   :  { %v600_v34 = vadd.f32 1e-05, %v599_v31 }
 0xa64   :  { %1474 = vrsqrt.f32 %v600_v34 }
 0xa6e   :  { %v1475_v39 = vpop.eup %1474 }
 0xa6f   :  { %v602_v40 = vmul.f32 %v1475_v39, %v594_v25 }
 0xa71   :  { %v603_v46 = vmul.f32 %v602_v40, %v1688_v60 }
 0xa73   :  { %v604_v47 = vadd.f32 %v603_v46, %v1693_v63 }
 0xa75   :  { %v605_v48 = vpack.c.bf16 %v604_v47, %v604_v47 }
 0xa77   :  { %1348 = vmatmul.mubr.msk.bf16.vlgmr.msra.gmra.mrb[16].mxu1 %vm183_vm1, %v605_v48 }
 0xa78   :  { %1352 = vmatpush3.bf16.msra.mxu1 %v1664_v52  ;;  %1355 = vmatprep.mubr.msk.bf16.mxu1 %vm1496_vm2, %v1495_v53 }
 0xa79   :  { %1353 = vmatprep.subr.bf16.mxu1 %v1495_v53 }
 0xa7c   :  { %1354 = vmatpush3.bf16.msra.mxu1 %v1678_v57 }
 0xa7d   :  { %709 = vmatprep.subr.bf16.mxu1 %v1493_v0 }
 0xa7f   :  { %1356 = vmatmul.mubr.msk.bf16.vlgmr.msra.gmra.mrb[20].mxu1 %vm183_vm1, %v605_v48 }
 0xa80   :  { %710 = vmatpush1.bf16.msra.mxu1 %v1532_v1  ;;  %1251 = vmatprep.mubr.msk.bf16.mxu1 %vm139_vm0, %v1250_v50  ;;  %v1249_v1 = vcombine.low %v1248_v49, %v1248_v49 }
 0xa81   :  { %711 = vmatprep.subr.bf16.mxu1 %v1493_v0 }
 0xa84   :  { %712 = vmatpush1.bf16.msra.mxu1 %v1538_v2 }
 0xa85   :  { %713 = vmatprep.subr.bf16.mxu1 %v1493_v0 }
 0xa88   :  { %714 = vmatpush1.bf16.msra.mxu1 %v1545_v3 }
 0xa89   :  { %715 = vmatprep.subr.bf16.mxu1 %v1493_v0 }
 0xa8c   :  { %716 = vmatpush1.bf16.msra.mxu1 %v1552_v4 }
 0xa8d   :  { %717 = vmatprep.subr.bf16.mxu1 %v1493_v0 }
 0xa90   :  { %718 = vmatpush1.bf16.msra.mxu1 %v1562_v7 }
 0xa91   :  { %719 = vmatprep.subr.bf16.mxu1 %v1493_v0 }
 0xa94   :  { %720 = vmatpush1.bf16.msra.mxu1 %v1570_v8 }
 0xa95   :  { %721 = vmatprep.subr.bf16.mxu1 %v1493_v0 }
 0xa98   :  { %722 = vmatpush1.bf16.msra.mxu1 %v1577_v9 }
 0xa99   :  { %723 = vmatprep.subr.bf16.mxu1 %v1493_v0 }
 0xa9c   :  { %724 = vmatpush1.bf16.msra.mxu1 %v1584_v10 }
 0xa9d   :  { %725 = vmatprep.subr.bf16.mxu1 %v1493_v0 }
 0xaa0   :  { %726 = vmatpush1.bf16.msra.mxu1 %v1591_v11 }
 0xaa1   :  { %727 = vmatprep.subr.bf16.mxu1 %v1493_v0 }
 0xaa4   :  { %728 = vmatpush1.bf16.msra.mxu1 %v1598_v12 }
 0xaa5   :  { %729 = vmatprep.subr.bf16.mxu1 %v1493_v0 }
 0xaa8   :  { %730 = vmatpush1.bf16.msra.mxu1 %v1605_v13 }
 0xaa9   :  { %731 = vmatprep.subr.bf16.mxu1 %v1493_v0 }
 0xaac   :  { %732 = vmatpush1.bf16.msra.mxu1 %v1612_v14 }
 0xaad   :  { %1383 = vmatprep.subr.bf16.mxu1 %v1495_v53 }
 0xaaf   :  { %742 = vmatmul.mubr.bf16.vlgmr.msra.gmra.mrb[24].mxu1 %v1249_v1 }
 0xab0   :  { %1387 = vmatprep.mubr.msk.bf16.mxu1 %vm1496_vm2, %v1495_v53 }
 0xb4a   :  { %v643_v2 = vpop.f32.mrb[16].mxu1 }
 0xb4b   :  { %v644_v3 = vadd.f32 %v643_v2, %v1743_v23  ;;  %v1349_v4 = vpop.f32.mrb[17].mxu1 }
 0xb4c   :  { %v646_v7 = vpop.f32.mrb[18].mxu1 }
 0xb4d   :  { %v689_v8 = vmul.f32 1.442695, %v644_v3  ;;  %v1350_v9 = vpop.f32.mrb[19].mxu1 }
 0xb4f   :  { %1476 = vpow2.f32 %v689_v8 }
 0xb52   :  { %v683_v10 = vpop.f32.mrb[20].mxu1 }
 0xb53   :  { %v1357_v11 = vpop.f32.mrb[21].mxu1  ;;  %v684_v13 = vadd.f32 %v683_v10, %v1750_v33 }
 0xb54   :  { %v686_v0 = vpop.f32.mrb[22].mxu1 }
 0xb55   :  { %v1358_v12 = vpop.f32.mrb[23].mxu1 }
 0xb59   :  { %v1477_v14 = vpop.eup %1476 }
 0xb5a   :  { %v1874_v54 = vadd.f32 %v1477_v14, %v1818_v29  ;;  %v692_v55 = vmul.f32 %v1477_v14, %v684_v13 }
 0xb5c   :  { %v1877_v42 = vadd.f32 %v692_v55, %v1821_v32 }
 0xb82   :  { %v743_v43 = vpop.f32.mrb[24].mxu1 }
 0xb83   :  { %v744_v61 = vadd.f32 %v743_v43, %v699_v56  ;;  %v745_v62 = vpop.f32.mrb[25].mxu1 }
 0xb84   :  { %v746_v5 = vpop.f32.mrb[26].mxu1 }
 0xb85   :  { %v747_v6 = vpop.f32.mrb[27].mxu1  ;;  %v749_v15 = vsel %vm183_vm1, %v744_v61, 0.0 }
 0xb86   :  { %750 = vadd.xlane.f32.xlu0 %v749_v15 }
 0xc13   :  { %v751_v16 = vpop.xlane.xlu0 %750 }
 0xc14   :  { %v752_v20 = vmul.f32 0.03125, %v751_v16 }
 0xc16   :  { %v753_v21 = vsub.f32 %v744_v61, %v752_v20 }
 0xc18   :  { %v754_v29 = vmul.f32 %v753_v21, %v753_v21 }
 0xc1a   :  { %v755_v24 = vsel %vm183_vm1, %v754_v29, 0.0 }
 0xc1b   :  { %756 = vadd.xlane.f32.xlu1 %v755_v24 }
 0xca8   :  { %v757_v32 = vpop.xlane.xlu1 %756 }
 0xca9   :  { %v758_v25 = vmul.f32 0.03125, %v757_v32 }
 0xcab   :  { %v759_v26 = vadd.f32 1e-05, %v758_v25 }
 0xcad   :  { %1478 = vrsqrt.f32 %v759_v26 }
 0xcb7   :  { %v1479_v44 = vpop.eup %1478 }
 0xcb8   :  { %v761_v27 = vmul.f32 %v1479_v44, %v753_v21 }
 0xcba   :  { %v762_v28 = vmul.f32 %v761_v27, %v1642_v38 }
 0xcbc   :  { %v763_v31 = vadd.f32 %v762_v28, %v1646_v41 }
 0xcbe   :  { %v764_v34 = vsel %vm183_vm1, %v763_v31, 0.0 }
 0xcbf   :  { %765 = vadd.xlane.f32.xlu0 %v764_v34  ;;  %v1450_v34 = vld [vmem:[%s1998_s3] sm:$0xff]  }
 0xcd5   :  { %881 = vrot.lane.b32.xlu0 %v1654_v45, %s1497_s0 }
 0xd4c   :  { %v766_v39 = vpop.xlane.xlu0 %765 }
 0xd4d   :  { %v767_v40 = vmul.f32 0.03125, %v766_v39 }
 0xd4f   :  { %v768_v46 = vsub.f32 %v763_v31, %v767_v40  ;;  %v1448_v31 = vld [vmem:[%s1997_s2 + $0x18] ss:$12 sps:$4 sm:$0xff]  }
 0xd50   :  { %v882_v45 = vpop.permute.xlu0 %881 }
 0xd51   :  { %v769_v47 = vmul.f32 %v768_v46, %v768_v46 }
 0xd53   :  { %v770_v48 = vsel %vm183_vm1, %v769_v47, 0.0  ;;  %v951_v47 = vrot.slane %v1635_v36, %v59_v18  ;;  %v1452_v18 = vld [vmem:[%s1998_s3 + $0x10] sm:$0xff]  }
 0xd54   :  { %771 = vadd.xlane.f32.xlu1 %v770_v48 }
 0xd65   :  { %883 = vrot.lane.b32.xlu1 %v1661_v51, %s1497_s0 }
 0xde1   :  { %v772_v49 = vpop.xlane.xlu1 %771 }
 0xde2   :  { %v773_v50 = vmul.f32 0.03125, %v772_v49 }
 0xde4   :  { %v774_v38 = vadd.f32 1e-05, %v773_v50  ;;  %v956_v50 = vrot.slane %v1622_v19, %v1630_v35  ;;  %v1453_v35 = vld [vmem:[%s1998_s3 + $0x18] sm:$0xff]  }
 0xde5   :  { %v884_v51 = vpop.permute.xlu1 %883 }
 0xde6   :  { %1480 = vrsqrt.f32 %v774_v38 }
 0xdf0   :  { %v1481_v41 = vpop.eup %1480 }
 0xdf1   :  { %v776_v1 = vmul.f32 %v1481_v41, %v768_v46 }
 0xdf3   :  { %v777_v2 = vmul.f32 %v776_v1, %v1688_v60 }
 0xdf5   :  { %v778_v3 = vadd.f32 %v777_v2, %v1693_v63  ;;  %v1451_v2 = vld [vmem:[%s1998_s3 + $0x8] sm:$0xff]  }
 0xdf7   :  { %v779_v4 = vpack.c.bf16 %v778_v3, %v778_v3  ;;  %v1455_v3 = vld [vmem:[%s1998_s3 + $0x28] sm:$0xff]  }
 0xdf9   :  { %1364 = vmatmul.mubr.msk.bf16.vlgmr.msra.gmra.mrb[12].mxu0 %vm183_vm1, %v779_v4 }
 0xdfa   :  { %1368 = vmatpush3.bf16.msra.mxu0 %v1664_v52  ;;  %1371 = vmatprep.mubr.msk.bf16.mxu0 %vm1496_vm2, %v1495_v53 }
 0xdfb   :  { %1369 = vmatprep.subr.bf16.mxu0 %v1495_v53 }
 0xdfe   :  { %1370 = vmatpush3.bf16.msra.mxu0 %v1678_v57 }
 0xdff   :  { %1375 = vmatprep.subr.bf16.mxu0 %v1495_v53 }
 0xe01   :  { %1372 = vmatmul.mubr.msk.bf16.vlgmr.msra.gmra.mrb[16].mxu0 %vm183_vm1, %v779_v4  ;;  %v1456_v4 = vld [vmem:[%s1998_s3 + $0x30] sm:$0xff]  }
 0xe02   :  { %1379 = vmatprep.mubr.msk.bf16.mxu0 %vm1496_vm2, %v1495_v53  ;;  %1376 = vmatpush3.bf16.msra.mxu0 %v882_v45  ;;  %v1457_v45 = vld [vmem:[%s1998_s3 + $0x38] sm:$0xff]  }
 0xe03   :  { %1377 = vmatprep.subr.bf16.mxu0 %v1495_v53 }
 0xe06   :  { %1378 = vmatpush3.bf16.msra.mxu0 %v884_v51  ;;  %v962_v51 = vrot.slane %v1622_v19, %v1638_v37  ;;  %v1047_v37 = vrot.slane %v1622_v19, %v1683_v58  ;;  %v1459_v58 = vld [vmem:[%s1997_s2 + $0x1c] ss:$12 sps:$4 sm:$0xff]  }
 0xe07   :  { %1391 = vmatprep.subr.bf16.mxu0 %v1495_v53 }
 0xecc   :  { %v817_v52 = vpop.f32.mrb[12].mxu0 }
 0xecd   :  { %v818_v60 = vadd.f32 %v817_v52, %v1743_v23  ;;  %v1365_v63 = vpop.f32.mrb[13].mxu0  ;;  %v871_v23 = vsub.s32 6, %v1616_v17 }
 0xece   :  { %v820_v57 = vpop.f32.mrb[14].mxu0 }
 0xecf   :  { %v863_v7 = vmul.f32 1.442695, %v818_v60  ;;  %v1366_v8 = vpop.f32.mrb[15].mxu0  ;;  %v872_v61 = vrot.slane %v1622_v19, %v871_v23 }
 0xed1   :  { %1482 = vpow2.f32 %v863_v7 }
 0xed4   :  { %v857_v9 = vpop.f32.mrb[16].mxu0 }
 0xed5   :  { %v1373_v10 = vpop.f32.mrb[17].mxu0  ;;  %v858_v12 = vadd.f32 %v857_v9, %v1750_v33  ;;  %v880_v33 = vrot.slane %v1635_v36, %v871_v23  ;;  %v1454_v36 = vld [vmem:[%s1998_s3 + $0x20] sm:$0xff]  }
 0xed6   :  { %v860_v11 = vpop.f32.mrb[18].mxu0 }
 0xed7   :  { %v1374_v0 = vpop.f32.mrb[19].mxu0 }
 0xedb   :  { %v1483_v13 = vpop.eup %1482 }
 0xedc   :  { %v865_v14 = vadd.f32 %v1483_v13, %v1874_v54  ;;  %v866_v55 = vmul.f32 %v1483_v13, %v858_v12  ;;  %v933_v54 = vrot.slane %v1622_v19, %v293_v30  ;;  %v1446_v30 = vld [vmem:[%s1997_s2] ss:$12 sps:$4 sm:$0xff]   ;;  %v1458_v19 = vld [vmem:[%s1997_s2 + $0x4] ss:$12 sps:$4 sm:$0xff]  }
 0xedd   :  { %1384 = vmatpush3.bf16.msra.mxu1 %v1446_v30 }
 0xede   :  { %v868_v56 = vadd.f32 1.0, %v865_v14  ;;  %v867_v43 = vadd.f32 %v866_v55, %v1877_v42  ;;  %1385 = vmatprep.subr.bf16.mxu1 %v1495_v53 }
 0xee0   :  { %1484 = vrcp.f32 %v868_v56  ;;  %v873_v62 = vadd.f32 %v872_v61, %v867_v43 }
 0xee1   :  { %1386 = vmatpush3.bf16.msra.mxu1 %v1448_v31 }
 0xee2   :  { %1411 = vmatprep.subr.bf16.mxu1 %v1495_v53 }
 0xeea   :  { %v1485_v5 = vpop.eup %1484 }
 0xeeb   :  { %v875_v6 = vmul.f32 %v1485_v5, %v873_v62 }
 0xeed   :  { %v876_v15 = vpack.c.bf16 %v875_v6, %v875_v6 }
 0xeef   :  { %1380 = vmatmul.mubr.msk.bf16.vlgmr.msra.gmra.mrb[20].mxu0 %vm183_vm1, %v876_v15 }
 0xef0   :  { %1407 = vmatprep.mubr.msk.bf16.mxu0 %vm1496_vm2, %v1495_v53  ;;  %1392 = vmatpush3.bf16.msra.mxu0 %v1450_v34 }
 0xef1   :  { %1393 = vmatprep.subr.bf16.mxu0 %v1495_v53 }
 0xef4   :  { %1394 = vmatpush3.bf16.msra.mxu0 %v1451_v2 }
 0xef5   :  { %1395 = vmatprep.subr.bf16.mxu0 %v1495_v53 }
 0xef8   :  { %1396 = vmatpush3.bf16.msra.mxu0 %v1452_v18 }
 0xef9   :  { %1397 = vmatprep.subr.bf16.mxu0 %v1495_v53 }
 0xefc   :  { %1398 = vmatpush3.bf16.msra.mxu0 %v1453_v35 }
 0xefd   :  { %1399 = vmatprep.subr.bf16.mxu0 %v1495_v53 }
 0xf00   :  { %1400 = vmatpush3.bf16.msra.mxu0 %v1454_v36 }
 0xf01   :  { %1401 = vmatprep.subr.bf16.mxu0 %v1495_v53 }
 0xf04   :  { %1402 = vmatpush3.bf16.msra.mxu0 %v1455_v3 }
 0xf05   :  { %1403 = vmatprep.subr.bf16.mxu0 %v1495_v53 }
 0xf08   :  { %1404 = vmatpush3.bf16.msra.mxu0 %v1456_v4 }
 0xf09   :  { %1405 = vmatprep.subr.bf16.mxu0 %v1495_v53 }
 0xf0c   :  { %1406 = vmatpush3.bf16.msra.mxu0 %v1457_v45 }
 0xfc2   :  { %v924_v42 = vpop.f32.mrb[20].mxu0 }
 0xfc3   :  { %v925_v16 = vadd.f32 %v924_v42, %v880_v33  ;;  %v1381_v20 = vpop.f32.mrb[21].mxu0 }
 0xfc4   :  { %v927_v21 = vpop.f32.mrb[22].mxu0 }
 0xfc5   :  { %v1916_v29 = vadd.f32 %v933_v54, %v925_v16  ;;  %v1382_v24 = vpop.f32.mrb[23].mxu0 }
 0xfc7   :  { %v935_v32 = vsel %vm183_vm1, %v1916_v29, 0.0 }
 0xfc8   :  { %936 = vadd.xlane.f32.xlu1 %v935_v32  ;;  %v1492_v32 = vld [vmem:[%s1996_s4 + $0x8] sm:$0xff] }
0x1055   :  { %v937_v25 = vpop.xlane.xlu1 %936 }
0x1056   :  { %v938_v26 = vmul.f32 0.03125, %v937_v25  ;;  %v1153_v25 = vrot.slane %v1492_v32, %v228_v59 }
0x1058   :  { %v939_v44 = vsub.f32 %v1916_v29, %v938_v26 }
0x105a   :  { %v940_v27 = vmul.f32 %v939_v44, %v939_v44 }
0x105c   :  { %v941_v28 = vsel %vm183_vm1, %v940_v27, 0.0 }
0x105d   :  { %942 = vadd.xlane.f32.xlu0 %v941_v28 }
0x10ea   :  { %v943_v39 = vpop.xlane.xlu0 %942 }
0x10eb   :  { %v944_v40 = vmul.f32 0.03125, %v943_v39 }
0x10ed   :  { %v945_v46 = vadd.f32 1e-05, %v944_v40 }
0x10ef   :  { %1486 = vrsqrt.f32 %v945_v46 }
0x10f9   :  { %v1487_v48 = vpop.eup %1486 }
0x10fa   :  { %v947_v49 = vmul.f32 %v1487_v48, %v939_v44  ;;  %v1158_v44 = vrot.slane %v1492_v32, %v234_v22 }
0x10fc   :  { %v952_v38 = vmul.f32 %v951_v47, %v947_v49 }
0x10fe   :  { %v957_v41 = vadd.f32 %v956_v50, %v952_v38 }
0x1100   :  { %v958_v1 = vpack.c.bf16 %v957_v41, %v957_v41 }
0x1102   :  { %1388 = vmatmul.mubr.msk.bf16.vlgmr.msra.gmra.mrb[28].mxu1 %vm183_vm1, %v958_v1 }
0x1103   :  { %1415 = vmatprep.mubr.msk.bf16.mxu1 %vm1496_vm2, %v1495_v53  ;;  %1412 = vmatpush3.bf16.msra.mxu1 %v1458_v19 }
0x1104   :  { %1413 = vmatprep.subr.bf16.mxu1 %v1495_v53 }
0x1107   :  { %1414 = vmatpush3.bf16.msra.mxu1 %v1459_v58 }
0x11d5   :  { %v1012_v52 = vpop.f32.mrb[28].mxu1 }
0x11d6   :  { %v1013_v60 = vadd.f32 %v1012_v52, %v962_v51  ;;  %v1389_v63 = vpop.f32.mrb[29].mxu1 }
0x11d7   :  { %v1015_v57 = vpop.f32.mrb[30].mxu1 }
0x11d8   :  { %v1019_v7 = vmul.f32 0.044715, %v1013_v60  ;;  %v1390_v8 = vpop.f32.mrb[31].mxu1  ;;  %v1018_v13 = vmul.f32 0.5, %v1013_v60 }
0x11da   :  { %v1020_v9 = vmul.f32 %v1019_v7, %v1013_v60 }
0x11dc   :  { %v1021_v10 = vmul.f32 %v1020_v9, %v1013_v60 }
0x11de   :  { %v1022_v11 = vadd.f32 %v1021_v10, %v1013_v60 }
0x11e0   :  { %v1023_v0 = vmul.f32 0.7978846, %v1022_v11 }
0x11e2   :  { %1488 = vtanh.f32 %v1023_v0 }
0x11ec   :  { %v1489_v12 = vpop.eup %1488 }
0x11ed   :  { %v1025_v14 = vadd.f32 1.0, %v1489_v12 }
0x11ef   :  { %v1026_v55 = vmul.f32 %v1025_v14, %v1018_v13 }
0x11f1   :  { %v1027_v56 = vpack.c.bf16 %v1026_v55, %v1026_v55 }
0x11f3   :  { %1408 = vmatmul.mubr.bf16.vlgmr.msra.gmra.mrb[24].mxu0 %v1027_v56 }
0x12c6   :  { %v1130_v43 = vpop.f32.mrb[24].mxu0 }
0x12c7   :  { %v1131_v23 = vadd.f32 %v1130_v43, %v1047_v37  ;;  %v1409_v61 = vpop.f32.mrb[25].mxu0 }
0x12c8   :  { %v1133_v62 = vpop.f32.mrb[26].mxu0 }
0x12c9   :  { %v1410_v5 = vpop.f32.mrb[27].mxu0  ;;  %v1136_v6 = vadd.f32 %v1131_v23, %v1916_v29 }
0x12cb   :  { %v1137_v15 = vsel %vm183_vm1, %v1136_v6, 0.0 }
0x12cc   :  { %1138 = vadd.xlane.f32.xlu0 %v1137_v15 }
0x1359   :  { %v1139_v33 = vpop.xlane.xlu0 %1138 }
0x135a   :  { %v1140_v54 = vmul.f32 0.03125, %v1139_v33 }
0x135c   :  { %v1141_v42 = vsub.f32 %v1136_v6, %v1140_v54 }
0x135e   :  { %v1142_v16 = vmul.f32 %v1141_v42, %v1141_v42 }
0x1360   :  { %v1143_v20 = vsel %vm183_vm1, %v1142_v16, 0.0 }
0x1361   :  { %1144 = vadd.xlane.f32.xlu1 %v1143_v20 }
0x13ee   :  { %v1145_v21 = vpop.xlane.xlu1 %1144 }
0x13ef   :  { %v1146_v29 = vmul.f32 0.03125, %v1145_v21 }
0x13f1   :  { %v1147_v24 = vadd.f32 1e-05, %v1146_v29 }
0x13f3   :  { %1490 = vrsqrt.f32 %v1147_v24 }
0x13fd   :  { %v1491_v26 = vpop.eup %1490 }
0x13fe   :  { %v1149_v27 = vmul.f32 %v1491_v26, %v1141_v42 }
0x1400   :  { %v1154_v28 = vmul.f32 %v1153_v25, %v1149_v27 }
0x1402   :  { %v1159_v30 = vadd.f32 %v1158_v44, %v1154_v28 }
0x1404   :  { %v1160_v53 = vpack.c.bf16 %v1159_v30, %v1159_v30 }
0x1406   :  { %1416 = vmatmul.mubr.msk.bf16.vlgmr.msra.gmra.mrb[32].mxu1 %vm183_vm1, %v1160_v53 }
0x14d9   :  { %v1206_v31 = vpop.f32.mrb[32].mxu1 }
0x14da   :  { %1212 = vst [vmem:[%s1999_s5] sm:$0xff] %v1206_v31  ;;  %v1417_v34 = vpop.f32.mrb[33].mxu1 }
0x14db   :  { %v1209_v39 = vpop.f32.mrb[34].mxu1 }
0x14dc   :  { %v1418_v40 = vpop.f32.mrb[35].mxu1 }

</bundles_post_ra>
